<compile_context>
chip_gen: v6e
topology: v6e:2x2x1
jax: 0.10.0
libtpu: 0.0.40
codegen_flags: <defaults>
</compile_context>

<pallas_src>
import functools

import jax
import jax.numpy as jnp
from jax.experimental import pallas as pl
from jax.experimental.pallas import tpu as pltpu

_LANE = 128
_SUBLANE = 8


def _round_up(n, m):
    return ((n + m - 1) // m) * m


def _largest_divisor_leq(n, cap):
    cap = max(1, min(n, cap))
    for d in range(cap, 0, -1):
        if n % d == 0:
            return d
    return 1


def _vmem_capacity_bytes():
    try:
        return int(pltpu.get_tpu_info().vmem_capacity_bytes)
    except Exception:
        return 64 << 20  # conservative (v7x physical VMEM per TensorCore)


# ----------------- fused nearest-2x upsample + 3x3 conv (hot path) -----------------
def _fused_upconv_kernel(x_ref, w_ref, b_ref, o_ref, acc_ref):
    # x_ref:   (H+2, Wp+2, C)   bf16, zero-padded channel-last input (one batch item)
    # w_ref:   (2, 8, C, Cp)    bf16, resident phase weights for BOTH row phases,
    #                           index = [row_phase, col_phase*4 + row_tap*2 + col_tap]
    # b_ref:   (1, Cp)          f32 bias (lane-padded)
    # o_ref:   (2, TH*Wp, Cp)   [col_phase, flattened output pixels of this row tile]
    # acc_ref: (TH*Wp, Cp)      f32 scratch accumulator
    rt = pl.program_id(1)                       # row tile
    ra = pl.program_id(2)                       # row phase (0 or 1)
    wp = x_ref.shape[1] - 2
    cin = x_ref.shape[2]
    n, cp = acc_ref.shape
    th = n // wp
    row0 = rt * th + ra                         # padded-row start for row tap 0

    # 6 unique shifted slabs (row tap dr in {0,1}) x (abs col offset in {0,1,2}),
    # reused by both column phases; flattened to matmul-LHS form (TH*Wp, C).
    slabs = []
    for dr in range(2):
        per_col = []
        for c in range(3):
            s = x_ref[pl.ds(row0 + dr, th), pl.ds(c, wp), :]
            per_col.append(s.reshape(n, cin))
        slabs.append(per_col)

    bias_init = jnp.broadcast_to(b_ref[...].astype(jnp.float32), (n, cp))

    for cb in range(2):                         # column phase (static unroll)
        acc_ref[...] = bias_init                # bias-as-init (saves a VPU pass)
        for dr in range(2):
            for dc in range(2):
                acc_ref[...] += jnp.dot(
                    slabs[dr][cb + dc],
                    w_ref[ra, cb * 4 + dr * 2 + dc],
                    preferred_element_type=jnp.float32,
                )
        o_ref[cb] = acc_ref[...].astype(o_ref.dtype)


def _phase_weights(weight, cp):
    """Fold 3x3-conv-on-2x-nearest-upsample weights into per-phase 2x2 effective
    weights.  Returns (2, 8, C_in, cp):
    [row_phase, col_phase*4 + row_tap*2 + col_tap, C_in, C_out_pad] (f32)."""
    w_t = jnp.transpose(weight, (2, 3, 1, 0))          # (kh, kw, C_in, C_out)
    taps = (((0,), (1, 2)), ((0, 1), (2,)))            # [phase][tap] -> kernel idx
    per_row_phase = []
    for a in range(2):
        mats = []
        for b in range(2):
            for dr in range(2):
                for dc in range(2):
                    acc = jnp.zeros_like(w_t[0, 0])
                    for kh in taps[a][dr]:
                        for kw in taps[b][dc]:
                            acc = acc + w_t[kh, kw]
                    mats.append(acc)
        per_row_phase.append(jnp.stack(mats))           # (8, C_in, C_out)
    w_eff = jnp.stack(per_row_phase)                    # (2, 8, C_in, C_out)
    return jnp.pad(w_eff, ((0, 0), (0, 0), (0, 0), (0, cp - weight.shape[0])))


def _pick_conv_row_tile(H, Wp, Cp):
    # ~2 MiB f32 accumulator budget, capped for per-step latency; prefer >=2 tiles.
    cap = max(1, (2 << 20) // (Wp * Cp * 4))
    cap = min(cap, 32)
    if H >= 2:
        cap = min(cap, H // 2)
    return _largest_divisor_leq(H, cap)


@functools.partial(jax.jit, static_argnames=("channels_last",))
def fused_upsample_conv3x3(x, weight, bias, channels_last=False):
    """y = conv3x3(nearest_upsample_2x(x)) + bias.  NCHW in / NCHW (or NHWC) out."""
    B, C, H, W = x.shape
    c_out = weight.shape[0]
    Cp = _round_up(c_out, _LANE)        # lane-dense matmul N / store width
    Wp = _round_up(W, _SUBLANE)         # keeps in-kernel reshapes tile-aligned
    TH = _pick_conv_row_tile(H, Wp, Cp)
    n_rt = H // TH
    out_dtype = x.dtype

    # bf16 operands (f32 accumulation in-kernel).  Channel-last + 1-pixel zero pad
    # at ORIGINAL resolution: exactly the halo the fused conv needs.
    xp = jnp.transpose(x.astype(jnp.bfloat16), (0, 2, 3, 1))
    xp = jnp.pad(xp, ((0, 0), (1, 1), (1, 1 + Wp - W), (0, 0)))   # (B, H+2, Wp+2, C)

    w_eff = _phase_weights(weight.astype(jnp.float32), Cp).astype(jnp.bfloat16)
    bias_p = jnp.pad(bias.astype(jnp.float32), (0, Cp - c_out)).reshape(1, Cp)

    # VMEM budget from the tiled working set (double-buffered operands + scratch
    # + slab temporaries), clamped to ~90% of device VMEM capacity.
    out_isz = jnp.dtype(out_dtype).itemsize
    in_bytes = (H + 2) * (Wp + 2) * C * 2
    w_bytes = 2 * 8 * C * Cp * 2
    b_bytes = 8 * Cp * 4
    out_bytes = 2 * TH * Wp * Cp * out_isz
    acc_bytes = TH * Wp * Cp * 4
    slab_bytes = 6 * TH * Wp * C * 2
    need = 2 * (in_bytes + w_bytes + b_bytes + out_bytes) + acc_bytes + slab_bytes
    vmem_limit = need + need // 4 + (4 << 20)
    vmem_limit = max(vmem_limit, 32 << 20)
    vmem_limit = int(min(vmem_limit, int(0.9 * _vmem_capacity_bytes())))

    out = pl.pallas_call(
        _fused_upconv_kernel,
        out_shape=jax.ShapeDtypeStruct((B, n_rt, 2, 2, TH * Wp, Cp), out_dtype),
        grid=(B, n_rt, 2),
        in_specs=[
            # Input block index constant over (rt, ra): DMA'd once per batch item.
            pl.BlockSpec((None, H + 2, Wp + 2, C), lambda b, rt, ra: (b, 0, 0, 0)),
            # Resident weights (both row phases): constant index -> fetched once.
            pl.BlockSpec((2, 8, C, Cp), lambda b, rt, ra: (0, 0, 0, 0)),
            pl.BlockSpec((1, Cp), lambda b, rt, ra: (0, 0)),
        ],
        out_specs=pl.BlockSpec((None, None, None, 2, TH * Wp, Cp),
                               lambda b, rt, ra: (b, rt, ra, 0, 0, 0)),
        scratch_shapes=[pltpu.VMEM((TH * Wp, Cp), jnp.float32)],
        compiler_params=pltpu.CompilerParams(
            dimension_semantics=("parallel", "parallel", "arbitrary"),
            vmem_limit_bytes=vmem_limit,
        ),
    )(xp, w_eff, bias_p)

    # (B, rt, ra, cb, TH*Wp, Cp): slice lane/col padding, then the single
    # output-sized transpose required for the requested layout.
    out = out.reshape(B, n_rt, 2, 2, TH, Wp, Cp)[..., :W, :c_out]
    if channels_last:
        return jnp.transpose(out, (0, 1, 4, 2, 5, 3, 6)).reshape(B, 2 * H, 2 * W, c_out)
    return jnp.transpose(out, (0, 6, 1, 4, 2, 5, 3)).reshape(B, c_out, 2 * H, 2 * W)


# ----------------- nearest 2x upsample only (use_conv=False path) -----------------
def _nearest2x_rowdup_kernel(x_ref, o_ref):
    # x_ref: (TC, TH, 2W) width-duplicated rows; o_ref: (TC, TH, 4W) = [row a=0 | row a=1]
    v = x_ref[...]
    w2 = x_ref.shape[-1]
    o_ref[:, :, 0:w2] = v
    o_ref[:, :, w2:2 * w2] = v


def _pick_plain_tiles(C, H, W, itemsize):
    # Row tile: sublane-aligned divisor of H (or the full extent).
    cands = [d for d in range(1, H + 1)
             if H % d == 0 and d % _SUBLANE == 0 and d <= 128]
    th = max(cands) if cands else H
    # Channel tile: keep the (in + out) block around ~2 MiB.
    blk_row_bytes = max(1, th * 6 * W * itemsize)
    tc = _largest_divisor_leq(C, max(1, (2 << 20) // blk_row_bytes))
    return tc, th


@jax.jit
def upsample_nearest_2x(x):
    B, C, H, W = x.shape
    # Width (lane) duplication at the HBM roofline in XLA; the Pallas kernel does the
    # row duplication with full-width stores.  The final reshape is a free bitcast.
    # TODO(synk): do the lane interleave in-kernel once a cheap lane-expand exists.
    xw = jnp.repeat(x, 2, axis=3)                       # (B, C, H, 2W)
    TC, TH = _pick_plain_tiles(C, H, W, jnp.dtype(x.dtype).itemsize)
    out = pl.pallas_call(
        _nearest2x_rowdup_kernel,
        out_shape=jax.ShapeDtypeStruct((B, C, H, 4 * W), x.dtype),
        grid=(B, C // TC, H // TH),
        in_specs=[pl.BlockSpec((None, TC, TH, 2 * W), lambda b, ci, ri: (b, ci, ri, 0))],
        out_specs=pl.BlockSpec((None, TC, TH, 4 * W), lambda b, ci, ri: (b, ci, ri, 0)),
        compiler_params=pltpu.CompilerParams(
            dimension_semantics=("parallel", "parallel", "parallel")),
    )(xw)
    return out.reshape(B, C, 2 * H, 2 * W)              # free: (H, 4W) == (2H, 2W)


# ---------------------------------- module wrapper ----------------------------------
class UpsamplePallas:
    """Pallas equivalent of Upsample(channels, use_conv, dims=2, out_channels)."""

    def __init__(self, channels, use_conv, dims=2, out_channels=None, key=None):
        assert dims == 2  # TODO(synk): dims=1 / dims=3 variants not implemented
        self.channels = channels
        self.out_channels = out_channels or channels
        self.use_conv = use_conv
        self.dims = dims
        if use_conv:
            key = jax.random.PRNGKey(42) if key is None else key
            kw, kb = jax.random.split(key)
            fan_in = channels * 3 * 3
            bound = 1.0 / (fan_in ** 0.5)
            # Deterministic synthetic init (PyTorch Conv2d-like uniform ranges).
            self.weight = jax.random.uniform(
                kw, (self.out_channels, channels, 3, 3), jnp.float32, -bound, bound)
            self.bias = jax.random.uniform(
                kb, (self.out_channels,), jnp.float32, -bound, bound)

    def __call__(self, x, channels_last=False):
        assert x.shape[1] == self.channels
        if not self.use_conv:
            return upsample_nearest_2x(x)
        return fused_upsample_conv3x3(x, self.weight, self.bias,
                                      channels_last=channels_last)


# ---------------------------- reference (plain JAX/XLA) ----------------------------
def _reference(x, weight, bias):
    up = jnp.repeat(jnp.repeat(x, 2, axis=2), 2, axis=3)
    y = jax.lax.conv_general_dilated(
        up, weight, window_strides=(1, 1), padding=((1, 1), (1, 1)),
        dimension_numbers=("NCHW", "OIHW", "NCHW"))
    return y + bias[None, :, None, None]


if __name__ == "__main__":
    key = jax.random.PRNGKey(0)
    kx, kp, kx2 = jax.random.split(key, 3)
    B, C, H, W = 2, 4, 16, 16
    x = jax.random.normal(kx, (B, C, H, W), jnp.float32)

    # use_conv=True: fused upsample + 3x3 conv (hot path; bf16 operands -> relaxed tol)
    mod = UpsamplePallas(channels=C, use_conv=True, dims=2, key=kp)
    y = jax.block_until_ready(mod(x))
    y_ref = _reference(x, mod.weight, mod.bias)
    assert y.shape == (B, C, 2 * H, 2 * W), y.shape
    assert jnp.allclose(y, y_ref, rtol=2e-2, atol=2e-2), \
        float(jnp.max(jnp.abs(y - y_ref)))

    # odd shapes: W not a multiple of 8, C_out != C_in, neither lane-aligned
    B2, C2, H2, W2, O2 = 1, 5, 10, 12, 7
    x2 = jax.random.normal(kx2, (B2, C2, H2, W2), jnp.float32)
    mod2 = UpsamplePallas(channels=C2, use_conv=True, dims=2, out_channels=O2,
                          key=jax.random.PRNGKey(3))
    y2 = jax.block_until_ready(mod2(x2))
    y2_ref = _reference(x2, mod2.weight, mod2.bias)
    assert y2.shape == (B2, O2, 2 * H2, 2 * W2), y2.shape
    assert jnp.allclose(y2, y2_ref, rtol=2e-2, atol=2e-2), \
        float(jnp.max(jnp.abs(y2 - y2_ref)))

    # use_conv=False: pure nearest 2x upsample (exact)
    mod3 = UpsamplePallas(channels=C, use_conv=False, dims=2)
    y3 = jax.block_until_ready(mod3(x))
    y3_ref = jnp.repeat(jnp.repeat(x, 2, axis=2), 2, axis=3)
    assert jnp.allclose(y3, y3_ref), float(jnp.max(jnp.abs(y3 - y3_ref)))

    print("KERNEL_OK")
</pallas_src>

<mosaic_0001>
module attributes {stable_mosaic.version = 11 : i64} {
  func.func @_fused_upconv_kernel(%arg0: i32, %arg1: i32, %arg2: i32, %arg3: memref<1x18x18x4xbf16, #tpu.memory_space<vmem>>, %arg4: memref<2x8x4x128xbf16, #tpu.memory_space<vmem>>, %arg5: memref<1x128xf32, #tpu.memory_space<vmem>>, %arg6: memref<1x1x1x2x128x128xf32, #tpu.memory_space<vmem>>, %arg7: memref<128x128xf32, #tpu.memory_space<vmem>>) attributes {dimension_semantics = [#tpu.dimension_semantics<parallel>, #tpu.dimension_semantics<parallel>, #tpu.dimension_semantics<arbitrary>], iteration_bounds = array<i64: 2, 2, 2>, scalar_prefetch = 0 : i64, scratch_operands = 1 : i64, tpu.core_type = #tpu.core_type<tc>, window_params = [{transform_indices = @transform_0, window_bounds = array<i64: 1, 18, 18, 4>}, {pipeline_mode = #tpu.pipeline_mode<synchronous>, transform_indices = @transform_1, window_bounds = array<i64: 2, 8, 4, 128>}, {pipeline_mode = #tpu.pipeline_mode<synchronous>, transform_indices = @transform_2, window_bounds = array<i64: 1, 128>}, {transform_indices = @transform_3, window_bounds = array<i64: 1, 1, 1, 2, 128, 128>}]} {
    %c8_i32 = arith.constant 8 : i32
    %0 = arith.muli %arg1, %c8_i32 : i32
    %1 = arith.addi %0, %arg2 : i32
    %c0_i32 = arith.constant 0 : i32
    %2 = arith.addi %1, %c0_i32 : i32
    %c0 = arith.constant 0 : index
    %3 = arith.index_cast %2 : i32 to index
    %c0_0 = arith.constant 0 : index
    %c0_1 = arith.constant 0 : index
    %4 = vector.load %arg3[%c0, %3, %c0_0, %c0_1] : memref<1x18x18x4xbf16, #tpu.memory_space<vmem>>, vector<1x8x16x4xbf16>
    %5 = vector.shape_cast %4 : vector<1x8x16x4xbf16> to vector<8x16x4xbf16>
    %6 = vector.shape_cast %5 : vector<8x16x4xbf16> to vector<128x4xbf16>
    %c0_i32_2 = arith.constant 0 : i32
    %7 = arith.addi %1, %c0_i32_2 : i32
    %c0_3 = arith.constant 0 : index
    %8 = arith.index_cast %7 : i32 to index
    %c1 = arith.constant 1 : index
    %c0_4 = arith.constant 0 : index
    %9 = vector.load %arg3[%c0_3, %8, %c1, %c0_4] : memref<1x18x18x4xbf16, #tpu.memory_space<vmem>>, vector<1x8x16x4xbf16>
    %10 = vector.shape_cast %9 : vector<1x8x16x4xbf16> to vector<8x16x4xbf16>
    %11 = vector.shape_cast %10 : vector<8x16x4xbf16> to vector<128x4xbf16>
    %c0_i32_5 = arith.constant 0 : i32
    %12 = arith.addi %1, %c0_i32_5 : i32
    %c0_6 = arith.constant 0 : index
    %13 = arith.index_cast %12 : i32 to index
    %c2 = arith.constant 2 : index
    %c0_7 = arith.constant 0 : index
    %14 = vector.load %arg3[%c0_6, %13, %c2, %c0_7] : memref<1x18x18x4xbf16, #tpu.memory_space<vmem>>, vector<1x8x16x4xbf16>
    %15 = vector.shape_cast %14 : vector<1x8x16x4xbf16> to vector<8x16x4xbf16>
    %16 = vector.shape_cast %15 : vector<8x16x4xbf16> to vector<128x4xbf16>
    %c1_i32 = arith.constant 1 : i32
    %17 = arith.addi %1, %c1_i32 : i32
    %c0_8 = arith.constant 0 : index
    %18 = arith.index_cast %17 : i32 to index
    %c0_9 = arith.constant 0 : index
    %c0_10 = arith.constant 0 : index
    %19 = vector.load %arg3[%c0_8, %18, %c0_9, %c0_10] : memref<1x18x18x4xbf16, #tpu.memory_space<vmem>>, vector<1x8x16x4xbf16>
    %20 = vector.shape_cast %19 : vector<1x8x16x4xbf16> to vector<8x16x4xbf16>
    %21 = vector.shape_cast %20 : vector<8x16x4xbf16> to vector<128x4xbf16>
    %c1_i32_11 = arith.constant 1 : i32
    %22 = arith.addi %1, %c1_i32_11 : i32
    %c0_12 = arith.constant 0 : index
    %23 = arith.index_cast %22 : i32 to index
    %c1_13 = arith.constant 1 : index
    %c0_14 = arith.constant 0 : index
    %24 = vector.load %arg3[%c0_12, %23, %c1_13, %c0_14] : memref<1x18x18x4xbf16, #tpu.memory_space<vmem>>, vector<1x8x16x4xbf16>
    %25 = vector.shape_cast %24 : vector<1x8x16x4xbf16> to vector<8x16x4xbf16>
    %26 = vector.shape_cast %25 : vector<8x16x4xbf16> to vector<128x4xbf16>
    %c1_i32_15 = arith.constant 1 : i32
    %27 = arith.addi %1, %c1_i32_15 : i32
    %c0_16 = arith.constant 0 : index
    %28 = arith.index_cast %27 : i32 to index
    %c2_17 = arith.constant 2 : index
    %c0_18 = arith.constant 0 : index
    %29 = vector.load %arg3[%c0_16, %28, %c2_17, %c0_18] : memref<1x18x18x4xbf16, #tpu.memory_space<vmem>>, vector<1x8x16x4xbf16>
    %30 = vector.shape_cast %29 : vector<1x8x16x4xbf16> to vector<8x16x4xbf16>
    %31 = vector.shape_cast %30 : vector<8x16x4xbf16> to vector<128x4xbf16>
    %c0_19 = arith.constant 0 : index
    %c0_20 = arith.constant 0 : index
    %32 = vector.load %arg5[%c0_19, %c0_20] : memref<1x128xf32, #tpu.memory_space<vmem>>, vector<1x128xf32>
    %33 = vector.shape_cast %32 : vector<1x128xf32> to vector<1x128xf32>
    %34 = vector.broadcast %33 : vector<1x128xf32> to vector<128x128xf32>
    %c0_21 = arith.constant 0 : index
    %c0_22 = arith.constant 0 : index
    %35 = vector.load %arg7[%c0_21, %c0_22] : memref<128x128xf32, #tpu.memory_space<vmem>>, vector<128x128xf32>
    tpu.vector_store %arg7[%c0_21, %c0_22], %34 {strides = array<i32>} : memref<128x128xf32, #tpu.memory_space<vmem>>, vector<128x128xf32>,
    %c0_23 = arith.constant 0 : index
    %c0_24 = arith.constant 0 : index
    %36 = vector.load %arg7[%c0_23, %c0_24] : memref<128x128xf32, #tpu.memory_space<vmem>>, vector<128x128xf32>
    %37 = arith.index_cast %arg2 : i32 to index
    %c0_25 = arith.constant 0 : index
    %c0_26 = arith.constant 0 : index
    %c0_27 = arith.constant 0 : index
    %38 = vector.load %arg4[%37, %c0_25, %c0_26, %c0_27] : memref<2x8x4x128xbf16, #tpu.memory_space<vmem>>, vector<1x1x4x128xbf16>
    %39 = vector.shape_cast %38 : vector<1x1x4x128xbf16> to vector<4x128xbf16>
    %cst = arith.constant dense<0.000000e+00> : vector<128x128xf32>
    %40 = tpu.matmul %6, %39, %cst {dimension_numbers = #tpu.dot_dimension_numbers<[1], [0], [0], [1], [0, 0, 1, 1], [], []>} : vector<128x4xbf16>, vector<4x128xbf16>, vector<128x128xf32> -> vector<128x128xf32>
    %41 = arith.addf %36, %40 : vector<128x128xf32>
    %c0_28 = arith.constant 0 : index
    %c0_29 = arith.constant 0 : index
    %42 = vector.load %arg7[%c0_28, %c0_29] : memref<128x128xf32, #tpu.memory_space<vmem>>, vector<128x128xf32>
    tpu.vector_store %arg7[%c0_28, %c0_29], %41 {strides = array<i32>} : memref<128x128xf32, #tpu.memory_space<vmem>>, vector<128x128xf32>,
    %c0_30 = arith.constant 0 : index
    %c0_31 = arith.constant 0 : index
    %43 = vector.load %arg7[%c0_30, %c0_31] : memref<128x128xf32, #tpu.memory_space<vmem>>, vector<128x128xf32>
    %44 = arith.index_cast %arg2 : i32 to index
    %c1_32 = arith.constant 1 : index
    %c0_33 = arith.constant 0 : index
    %c0_34 = arith.constant 0 : index
    %45 = vector.load %arg4[%44, %c1_32, %c0_33, %c0_34] : memref<2x8x4x128xbf16, #tpu.memory_space<vmem>>, vector<1x1x4x128xbf16>
    %46 = vector.shape_cast %45 : vector<1x1x4x128xbf16> to vector<4x128xbf16>
    %cst_35 = arith.constant dense<0.000000e+00> : vector<128x128xf32>
    %47 = tpu.matmul %11, %46, %cst_35 {dimension_numbers = #tpu.dot_dimension_numbers<[1], [0], [0], [1], [0, 0, 1, 1], [], []>} : vector<128x4xbf16>, vector<4x128xbf16>, vector<128x128xf32> -> vector<128x128xf32>
    %48 = arith.addf %43, %47 : vector<128x128xf32>
    %c0_36 = arith.constant 0 : index
    %c0_37 = arith.constant 0 : index
    %49 = vector.load %arg7[%c0_36, %c0_37] : memref<128x128xf32, #tpu.memory_space<vmem>>, vector<128x128xf32>
    tpu.vector_store %arg7[%c0_36, %c0_37], %48 {strides = array<i32>} : memref<128x128xf32, #tpu.memory_space<vmem>>, vector<128x128xf32>,
    %c0_38 = arith.constant 0 : index
    %c0_39 = arith.constant 0 : index
    %50 = vector.load %arg7[%c0_38, %c0_39] : memref<128x128xf32, #tpu.memory_space<vmem>>, vector<128x128xf32>
    %51 = arith.index_cast %arg2 : i32 to index
    %c2_40 = arith.constant 2 : index
    %c0_41 = arith.constant 0 : index
    %c0_42 = arith.constant 0 : index
    %52 = vector.load %arg4[%51, %c2_40, %c0_41, %c0_42] : memref<2x8x4x128xbf16, #tpu.memory_space<vmem>>, vector<1x1x4x128xbf16>
    %53 = vector.shape_cast %52 : vector<1x1x4x128xbf16> to vector<4x128xbf16>
    %cst_43 = arith.constant dense<0.000000e+00> : vector<128x128xf32>
    %54 = tpu.matmul %21, %53, %cst_43 {dimension_numbers = #tpu.dot_dimension_numbers<[1], [0], [0], [1], [0, 0, 1, 1], [], []>} : vector<128x4xbf16>, vector<4x128xbf16>, vector<128x128xf32> -> vector<128x128xf32>
    %55 = arith.addf %50, %54 : vector<128x128xf32>
    %c0_44 = arith.constant 0 : index
    %c0_45 = arith.constant 0 : index
    %56 = vector.load %arg7[%c0_44, %c0_45] : memref<128x128xf32, #tpu.memory_space<vmem>>, vector<128x128xf32>
    tpu.vector_store %arg7[%c0_44, %c0_45], %55 {strides = array<i32>} : memref<128x128xf32, #tpu.memory_space<vmem>>, vector<128x128xf32>,
    %c0_46 = arith.constant 0 : index
    %c0_47 = arith.constant 0 : index
    %57 = vector.load %arg7[%c0_46, %c0_47] : memref<128x128xf32, #tpu.memory_space<vmem>>, vector<128x128xf32>
    %58 = arith.index_cast %arg2 : i32 to index
    %c3 = arith.constant 3 : index
    %c0_48 = arith.constant 0 : index
    %c0_49 = arith.constant 0 : index
    %59 = vector.load %arg4[%58, %c3, %c0_48, %c0_49] : memref<2x8x4x128xbf16, #tpu.memory_space<vmem>>, vector<1x1x4x128xbf16>
    %60 = vector.shape_cast %59 : vector<1x1x4x128xbf16> to vector<4x128xbf16>
    %cst_50 = arith.constant dense<0.000000e+00> : vector<128x128xf32>
    %61 = tpu.matmul %26, %60, %cst_50 {dimension_numbers = #tpu.dot_dimension_numbers<[1], [0], [0], [1], [0, 0, 1, 1], [], []>} : vector<128x4xbf16>, vector<4x128xbf16>, vector<128x128xf32> -> vector<128x128xf32>
    %62 = arith.addf %57, %61 : vector<128x128xf32>
    %c0_51 = arith.constant 0 : index
    %c0_52 = arith.constant 0 : index
    %63 = vector.load %arg7[%c0_51, %c0_52] : memref<128x128xf32, #tpu.memory_space<vmem>>, vector<128x128xf32>
    tpu.vector_store %arg7[%c0_51, %c0_52], %62 {strides = array<i32>} : memref<128x128xf32, #tpu.memory_space<vmem>>, vector<128x128xf32>,
    %c0_53 = arith.constant 0 : index
    %c0_54 = arith.constant 0 : index
    %64 = vector.load %arg7[%c0_53, %c0_54] : memref<128x128xf32, #tpu.memory_space<vmem>>, vector<128x128xf32>
    %c0_55 = arith.constant 0 : index
    %c0_56 = arith.constant 0 : index
    %c0_57 = arith.constant 0 : index
    %c0_58 = arith.constant 0 : index
    %c0_59 = arith.constant 0 : index
    %c0_60 = arith.constant 0 : index
    %65 = vector.load %arg6[%c0_55, %c0_56, %c0_57, %c0_58, %c0_59, %c0_60] : memref<1x1x1x2x128x128xf32, #tpu.memory_space<vmem>>, vector<1x1x1x1x128x128xf32>
    %66 = vector.shape_cast %65 : vector<1x1x1x1x128x128xf32> to vector<128x128xf32>
    %67 = vector.shape_cast %64 : vector<128x128xf32> to vector<1x1x1x1x128x128xf32>
    tpu.vector_store %arg6[%c0_55, %c0_56, %c0_57, %c0_58, %c0_59, %c0_60], %67 {strides = array<i32>} : memref<1x1x1x2x128x128xf32, #tpu.memory_space<vmem>>, vector<1x1x1x1x128x128xf32>,
    %c0_61 = arith.constant 0 : index
    %c0_62 = arith.constant 0 : index
    %68 = vector.load %arg7[%c0_61, %c0_62] : memref<128x128xf32, #tpu.memory_space<vmem>>, vector<128x128xf32>
    tpu.vector_store %arg7[%c0_61, %c0_62], %34 {strides = array<i32>} : memref<128x128xf32, #tpu.memory_space<vmem>>, vector<128x128xf32>,
    %c0_63 = arith.constant 0 : index
    %c0_64 = arith.constant 0 : index
    %69 = vector.load %arg7[%c0_63, %c0_64] : memref<128x128xf32, #tpu.memory_space<vmem>>, vector<128x128xf32>
    %70 = arith.index_cast %arg2 : i32 to index
    %c4 = arith.constant 4 : index
    %c0_65 = arith.constant 0 : index
    %c0_66 = arith.constant 0 : index
    %71 = vector.load %arg4[%70, %c4, %c0_65, %c0_66] : memref<2x8x4x128xbf16, #tpu.memory_space<vmem>>, vector<1x1x4x128xbf16>
    %72 = vector.shape_cast %71 : vector<1x1x4x128xbf16> to vector<4x128xbf16>
    %cst_67 = arith.constant dense<0.000000e+00> : vector<128x128xf32>
    %73 = tpu.matmul %11, %72, %cst_67 {dimension_numbers = #tpu.dot_dimension_numbers<[1], [0], [0], [1], [0, 0, 1, 1], [], []>} : vector<128x4xbf16>, vector<4x128xbf16>, vector<128x128xf32> -> vector<128x128xf32>
    %74 = arith.addf %69, %73 : vector<128x128xf32>
    %c0_68 = arith.constant 0 : index
    %c0_69 = arith.constant 0 : index
    %75 = vector.load %arg7[%c0_68, %c0_69] : memref<128x128xf32, #tpu.memory_space<vmem>>, vector<128x128xf32>
    tpu.vector_store %arg7[%c0_68, %c0_69], %74 {strides = array<i32>} : memref<128x128xf32, #tpu.memory_space<vmem>>, vector<128x128xf32>,
    %c0_70 = arith.constant 0 : index
    %c0_71 = arith.constant 0 : index
    %76 = vector.load %arg7[%c0_70, %c0_71] : memref<128x128xf32, #tpu.memory_space<vmem>>, vector<128x128xf32>
    %77 = arith.index_cast %arg2 : i32 to index
    %c5 = arith.constant 5 : index
    %c0_72 = arith.constant 0 : index
    %c0_73 = arith.constant 0 : index
    %78 = vector.load %arg4[%77, %c5, %c0_72, %c0_73] : memref<2x8x4x128xbf16, #tpu.memory_space<vmem>>, vector<1x1x4x128xbf16>
    %79 = vector.shape_cast %78 : vector<1x1x4x128xbf16> to vector<4x128xbf16>
    %cst_74 = arith.constant dense<0.000000e+00> : vector<128x128xf32>
    %80 = tpu.matmul %16, %79, %cst_74 {dimension_numbers = #tpu.dot_dimension_numbers<[1], [0], [0], [1], [0, 0, 1, 1], [], []>} : vector<128x4xbf16>, vector<4x128xbf16>, vector<128x128xf32> -> vector<128x128xf32>
    %81 = arith.addf %76, %80 : vector<128x128xf32>
    %c0_75 = arith.constant 0 : index
    %c0_76 = arith.constant 0 : index
    %82 = vector.load %arg7[%c0_75, %c0_76] : memref<128x128xf32, #tpu.memory_space<vmem>>, vector<128x128xf32>
    tpu.vector_store %arg7[%c0_75, %c0_76], %81 {strides = array<i32>} : memref<128x128xf32, #tpu.memory_space<vmem>>, vector<128x128xf32>,
    %c0_77 = arith.constant 0 : index
    %c0_78 = arith.constant 0 : index
    %83 = vector.load %arg7[%c0_77, %c0_78] : memref<128x128xf32, #tpu.memory_space<vmem>>, vector<128x128xf32>
    %84 = arith.index_cast %arg2 : i32 to index
    %c6 = arith.constant 6 : index
    %c0_79 = arith.constant 0 : index
    %c0_80 = arith.constant 0 : index
    %85 = vector.load %arg4[%84, %c6, %c0_79, %c0_80] : memref<2x8x4x128xbf16, #tpu.memory_space<vmem>>, vector<1x1x4x128xbf16>
    %86 = vector.shape_cast %85 : vector<1x1x4x128xbf16> to vector<4x128xbf16>
    %cst_81 = arith.constant dense<0.000000e+00> : vector<128x128xf32>
    %87 = tpu.matmul %26, %86, %cst_81 {dimension_numbers = #tpu.dot_dimension_numbers<[1], [0], [0], [1], [0, 0, 1, 1], [], []>} : vector<128x4xbf16>, vector<4x128xbf16>, vector<128x128xf32> -> vector<128x128xf32>
    %88 = arith.addf %83, %87 : vector<128x128xf32>
    %c0_82 = arith.constant 0 : index
    %c0_83 = arith.constant 0 : index
    %89 = vector.load %arg7[%c0_82, %c0_83] : memref<128x128xf32, #tpu.memory_space<vmem>>, vector<128x128xf32>
    tpu.vector_store %arg7[%c0_82, %c0_83], %88 {strides = array<i32>} : memref<128x128xf32, #tpu.memory_space<vmem>>, vector<128x128xf32>,
    %c0_84 = arith.constant 0 : index
    %c0_85 = arith.constant 0 : index
    %90 = vector.load %arg7[%c0_84, %c0_85] : memref<128x128xf32, #tpu.memory_space<vmem>>, vector<128x128xf32>
    %91 = arith.index_cast %arg2 : i32 to index
    %c7 = arith.constant 7 : index
    %c0_86 = arith.constant 0 : index
    %c0_87 = arith.constant 0 : index
    %92 = vector.load %arg4[%91, %c7, %c0_86, %c0_87] : memref<2x8x4x128xbf16, #tpu.memory_space<vmem>>, vector<1x1x4x128xbf16>
    %93 = vector.shape_cast %92 : vector<1x1x4x128xbf16> to vector<4x128xbf16>
    %cst_88 = arith.constant dense<0.000000e+00> : vector<128x128xf32>
    %94 = tpu.matmul %31, %93, %cst_88 {dimension_numbers = #tpu.dot_dimension_numbers<[1], [0], [0], [1], [0, 0, 1, 1], [], []>} : vector<128x4xbf16>, vector<4x128xbf16>, vector<128x128xf32> -> vector<128x128xf32>
    %95 = arith.addf %90, %94 : vector<128x128xf32>
    %c0_89 = arith.constant 0 : index
    %c0_90 = arith.constant 0 : index
    %96 = vector.load %arg7[%c0_89, %c0_90] : memref<128x128xf32, #tpu.memory_space<vmem>>, vector<128x128xf32>
    tpu.vector_store %arg7[%c0_89, %c0_90], %95 {strides = array<i32>} : memref<128x128xf32, #tpu.memory_space<vmem>>, vector<128x128xf32>,
    %c0_91 = arith.constant 0 : index
    %c0_92 = arith.constant 0 : index
    %97 = vector.load %arg7[%c0_91, %c0_92] : memref<128x128xf32, #tpu.memory_space<vmem>>, vector<128x128xf32>
    %c0_93 = arith.constant 0 : index
    %c0_94 = arith.constant 0 : index
    %c0_95 = arith.constant 0 : index
    %c1_96 = arith.constant 1 : index
    %c0_97 = arith.constant 0 : index
    %c0_98 = arith.constant 0 : index
    %98 = vector.load %arg6[%c0_93, %c0_94, %c0_95, %c1_96, %c0_97, %c0_98] : memref<1x1x1x2x128x128xf32, #tpu.memory_space<vmem>>, vector<1x1x1x1x128x128xf32>
    %99 = vector.shape_cast %98 : vector<1x1x1x1x128x128xf32> to vector<128x128xf32>
    %100 = vector.shape_cast %97 : vector<128x128xf32> to vector<1x1x1x1x128x128xf32>
    tpu.vector_store %arg6[%c0_93, %c0_94, %c0_95, %c1_96, %c0_97, %c0_98], %100 {strides = array<i32>} : memref<1x1x1x2x128x128xf32, #tpu.memory_space<vmem>>, vector<1x1x1x1x128x128xf32>,
    return
  }
  func.func @transform_0(%arg0: i32, %arg1: i32, %arg2: i32) -> (i32, i32, i32, i32) {
    %c0_i32 = arith.constant 0 : i32
    %c0_i32_0 = arith.constant 0 : i32
    %c0_i32_1 = arith.constant 0 : i32
    %c0_i32_2 = arith.constant 0 : i32
    return %arg0, %c0_i32, %c0_i32_0, %c0_i32_1 : i32, i32, i32, i32
  }
  func.func @transform_1(%arg0: i32, %arg1: i32, %arg2: i32) -> (i32, i32, i32, i32) {
    %c0_i32 = arith.constant 0 : i32
    %c0_i32_0 = arith.constant 0 : i32
    %c0_i32_1 = arith.constant 0 : i32
    %c0_i32_2 = arith.constant 0 : i32
    %c0_i32_3 = arith.constant 0 : i32
    return %c0_i32, %c0_i32_0, %c0_i32_1, %c0_i32_2 : i32, i32, i32, i32
  }
  func.func @transform_2(%arg0: i32, %arg1: i32, %arg2: i32) -> (i32, i32) {
    %c0_i32 = arith.constant 0 : i32
    %c0_i32_0 = arith.constant 0 : i32
    %c0_i32_1 = arith.constant 0 : i32
    return %c0_i32, %c0_i32_0 : i32, i32
  }
  func.func @transform_3(%arg0: i32, %arg1: i32, %arg2: i32) -> (i32, i32, i32, i32, i32, i32) {
    %c0_i32 = arith.constant 0 : i32
    %c0_i32_0 = arith.constant 0 : i32
    %c0_i32_1 = arith.constant 0 : i32
    %c0_i32_2 = arith.constant 0 : i32
    return %arg0, %arg1, %arg2, %c0_i32, %c0_i32_0, %c0_i32_1 : i32, i32, i32, i32, i32, i32
  }
}

</mosaic_0001>

<bundles_post_ra>
// kernel: fused_upsample_conv3x3.1
= control target key start
LH: loop header
LB: loop body
LE: loop exit
PB: predicated region body
PF: predicated region fallthrough
CT: control target
= control target key end

     0   :  { %s3204_s12 = smov 0   ;;  %s3206_s13 = smov 0   ;;  %s4200_s0 = inlined_call_operand.vmem [shape: bf16[2,18,18,4], index: 0, kind: input, shape index: {}]   ;;  %s4201_s1 = inlined_call_operand.vmem [shape: bf16[2,8,4,128], index: 1, kind: input, shape index: {}]   ;;  %s4202_s2 = inlined_call_operand.vmem [shape: f32[1,128], index: 2, kind: input, shape index: {}]   ;;  %s4203_s3 = inlined_call_operand.vmem [shape: f32[2,2,2,2,128,128], index: 3, kind: output, shape index: {}]  }
   0x1   :  { %s3208_s14 = smov 0   ;;  %s3210_s15 = smov 0  }
   0x2   :  { %s3212_s16 = smov 0   ;;  %s3214_s17 = smov 0  }
   0x3   :  { %s3216_s18 = smov 0  }
   0x4 LB: > { %s25_s19 = sadd.s32 1, %s3170_s15  ;;  %s28_s20 = sadd.s32 1, %s3174_s16  ;;  %s3182_s18 = sphi %s3216_s18, %s13_s18   ;;  %s3178_s17 = sphi %s3214_s17, %s4251_s17   ;;  %s3174_s16 = sphi %s3212_s16, %s4250_s16   ;;  %s3170_s15 = sphi %s3210_s15, %s4249_s15   ;;  %s3166_s14 = sphi %s3208_s14, %s4248_s14   ;;  %s3162_s13 = sphi %s3206_s13, %s4247_s13   ;;  %s3158_s12 = sphi %s3204_s12, %s4246_s12  }
   0x5   : > { %p26_p0 = scmp.ge.s32.totalorder %s25_s19, 2  ;;  %p2611_p1 = scmp.ge.s32.totalorder %s3182_s18, 1 }
   0x6   : > { %p160_p2 = scmp.lt.s32.totalorder %s3182_s18, 9  ;;  %s32_s21 = sadd.s32 1, %s3178_s17 }
   0x7   : > { %s4253_s19 = smov (%p26_p0, %s25_s19), 0  ;;  %s4255_s20 = smov (!%p26_p0, %s28_s20), %s3174_s16 }
   0x8   : > { %p161_p3 = pnand %p2611_p1, %p160_p2  ;;  %p30_p4 = scmp.ge.s32.totalorder %s4255_s20, 2 }
   0xa   : > { %s4257_s20 = smov (%p30_p4, %s4255_s20), 0  ;;  %s4259_s21 = smov (!%p30_p4, %s32_s21), %s3178_s17 }
   0xb   : > { %p34_p5 = scmp.ge.s32.totalorder %s4259_s21, 2  ;;  %164 = sbr.rel (%p161_p3) target bundleno = 373 (0x175), region = 32 }
   0xd   : > { %s4261_s21 = smov (%p34_p5, %s4259_s21), 0 }
  0x10   : > { %s2823_s22 = sshll.u32 %s3158_s12, 4  ;;  %vm934_vm0 = vcmask 1041408   ;;  %p192_p6 = scmp.lt.s32.totalorder %s3166_s14, 1  ;;  %vm909_vm1 = vcmask 31744   ;;  %vm240_vm2 = vsmask.f32 3328 }
  0x11   : > { %s875_s25 = scalar_lea.vmem %s4201_s1, %s2823_s22  ;;  %s2617_s26 = sshll.u32 %s3162_s13, 3  ;;  %vm241_vm3 = vsmask.f32 7440  ;;  %vm467_vm5 = vcmask 1042432   ;;  %vm468_vm6 = vcmask 1046532  }
  0x12   : > { %v876_v0 = vld [vmem:[%s875_s25] sm:$0x3]  ;;  %s4263_s14 = smov (!%p192_p6, %s3166_s14), 1  ;;  %v2689_v1 = vld [vmem:[%s875_s25 + $0x2] sm:$0x3]  ;;  %s212_s27 = sadd.s32 %s3158_s12, %s2617_s26  ;;  %vm3346_vm4 = vmor %vm240_vm2, %vm241_vm3 }
  0x13   : > { %3047 = vmatprep.subr.msk.bf16.mxu0 %vm934_vm0, %v876_v0  ;;  %v936_v2 = vsel %vm934_vm0, %v876_v0, 0  ;;  %3048 = vmatprep.subr.msk.bf16.mxu1 %vm934_vm0, %v2689_v1  ;;  %v1136_v3 = vsel %vm934_vm0, %v2689_v1, 0  ;;  %v2708_v4 = vld [vmem:[%s875_s25 + $0x4] sm:$0x3]  ;;  %v2727_v5 = vld [vmem:[%s875_s25 + $0x6] sm:$0x3]  ;;  %vm3696_vm7 = vmor %vm467_vm5, %vm468_vm6 }
  0x14   : > { %2904 = vmatpush3.bf16.msra.mxu0 %v936_v2  ;;  %s3055_s28 = smul.u32 216, %s4263_s14  ;;  %2922 = vmatpush3.bf16.msra.mxu1 %v1136_v3  ;;  %v3263_v6 = vld [vmem:[%s875_s25 + $0x8] sm:$0x3]  ;;  %v3267_v7 = vld [vmem:[%s875_s25 + $0xa] sm:$0x3]  ;;  %v1344_v9 = vsel %vm934_vm0, %v2708_v4, 0 }
  0x15   : > { %s2822_s29 = smul.u32 12, %s212_s27  ;;  %3049 = vmatprep.subr.msk.bf16.mxu0 %vm934_vm0, %v2708_v4  ;;  %3050 = vmatprep.subr.msk.bf16.mxu1 %vm934_vm0, %v2727_v5  ;;  %v3269_v8 = vld [vmem:[%s875_s25 + $0xc] sm:$0x3]  ;;  %v3276_v10 = vsel %vm934_vm0, %v2727_v5, 0  ;;  %v3278_v11 = vld [vmem:[%s875_s25 + $0xe] sm:$0x3] }
  0x16   : > { %s196_s5 = scalar_lea.vmem %s4200_s0, %s3055_s28  ;;  %v3284_v12 = vsel %vm934_vm0, %v3263_v6, 0  ;;  %v3288_v13 = vsel %vm934_vm0, %v3267_v7, 0  ;;  %v3292_v14 = vsel %vm934_vm0, %v3269_v8, 0  ;;  %v3296_v15 = vsel %vm934_vm0, %v3278_v11, 0  ;;  %p199_p7 = scmp.lt.s32.totalorder %s3162_s13, 1 }
  0x17   : > { %s3280_s6 = scalar_lea.vmem %s196_s5, %s2822_s29  ;;  %4215 = vst [vmem:[#allocation3_spill] sm:$0xff] %v3296_v15  ;;  %p201_p8 = scmp.lt.s32.totalorder %s3158_s12, 1 }
  0x18   : > { %v216_v16 = vld [vmem:[%s3280_s6] sm:$0xf]  ;;  %v3300_v17 = vld [vmem:[%s3280_s6 + $0x4] sm:$0xf]  ;;  %v218_v18 = vld [vmem:[%s3280_s6 + $0xc] sm:$0xf] }
  0x19   : > { %v244_v19 = vshrl.u32 %v216_v16, 16  ;;  %v247_v20 = vshll.u32 %v216_v16, 16  ;;  %v257_v21 = vshrl.u32 %v3300_v17, 16  ;;  %v4205_v22 = vrot.slane %v3300_v17, 5  ;;  %v3306_v23 = vld [vmem:[%s3280_s6 + $0x10] sm:$0xf] }
  0x1a   : > { %v2671_v24 = vcombine.low %v216_v16, %v3300_v17  ;;  %v268_v25 = vshrl.u32 %v218_v18, 16  ;;  %v271_v26 = vshll.u32 %v218_v18, 16  ;;  %v281_v27 = vshrl.u32 %v3306_v23, 16  ;;  %v220_v28 = vld [vmem:[%s3280_s6 + $0x18] sm:$0xf]  ;;  %s4265_s13 = smov (!%p199_p7, %s3162_s13), 1 }
  0x1b   : > { %v246_v29 = vrot.slane %v244_v19, 4  ;;  %v249_v30 = vrot.slane %v247_v20, 5  ;;  %v3313_v31 = vrot.slane %v4205_v22, 4  ;;  %v4204_v32 = vrot.slane %v3306_v23, 5  ;;  %v3317_v33 = vld [vmem:[%s3280_s6 + $0x1c] sm:$0xf] }
  0x1c   : > { %2905 = vmatprep.mubr.msk.bf16.mxu0 %vm909_vm1, %v2671_v24  ;;  %v270_v34 = vrot.slane %v268_v25, 4  ;;  %v273_v35 = vrot.slane %v271_v26, 5  ;;  %v2672_v36 = vcombine.low %v218_v18, %v3306_v23  ;;  %v292_v37 = vshrl.u32 %v220_v28, 16  ;;  %v222_v38 = vld [vmem:[%s3280_s6 + $0x24] sm:$0xf]  ;;  %s4267_s12 = smov (!%p201_p8, %s3158_s12), 1 }
  0x1d   : > { %v3324_v39 = vrot.slane %v4204_v32, 4  ;;  %v295_v40 = vshll.u32 %v220_v28, 16  ;;  %v305_v41 = vshrl.u32 %v3317_v33, 16  ;;  %v2673_v42 = vcombine.low %v220_v28, %v3317_v33  ;;  %v3329_v43 = vld [vmem:[%s3280_s6 + $0x28] sm:$0xf]  ;;  %s2613_s7 = sshll.u32 %s4267_s12, 5 }
  0x1e   : > { %2906 = vmatmul.mubr.msk.bf16.vlgmr.msra.gmra.mxu0 %vm909_vm1, %v2672_v36  ;;  %v3332_v44 = vrot.slane %v292_v37, 4  ;;  %v316_v45 = vshrl.u32 %v222_v38, 16  ;;  %v319_v46 = vshll.u32 %v222_v38, 16  ;;  %v329_v47 = vshrl.u32 %v3329_v43, 16  ;;  %v3336_v48 = vld [vmem:[%s3280_s6 + $0x8] sm:$0x1] }
  0x1f   : > { %v297_v49 = vrot.slane %v295_v40, 5  ;;  %2909 = vmatprep.mubr.msk.bf16.mxu0 %vm909_vm1, %v2673_v42  ;;  %2940 = vmatpush3.bf16.msra.mxu0 %v1344_v9  ;;  %v2674_v50 = vcombine.low %v222_v38, %v3329_v43  ;;  %v250_v51 = vor.u32 %v249_v30, %v246_v29  ;;  %v253_v52 = vshll.u32 %v3300_v17, 16  ;;  %v3342_v53 = vld [vmem:[%s3280_s6 + $0x14] sm:$0x1]  ;;  %v224_v59 = vld [vmem:[%s3280_s6 + $0x30] sm:$0xf] }
  0x20   : > { %v318_v54 = vrot.slane %v316_v45, 4  ;;  %v321_v55 = vrot.slane %v319_v46, 5  ;;  %v259_v57 = vrot.slane %v257_v21, 4  ;;  %v263_v58 = vshll.u32 %v3336_v48, 16  ;;  %3051 = vmatprep.subr.msk.bf16.mxu0 %vm934_vm0, %v3263_v6  ;;  %v3356_v0 = vld [vmem:[%s3280_s6 + $0x34] sm:$0xf] }
  0x21   : > { %v251_v60 = vrot.slane %v250_v51, 4  ;;  %v255_v61 = vrot.slane %v253_v52, 5  ;;  %v274_v63 = vor.u32 %v273_v35, %v270_v34  ;;  %v277_v2 = vshll.u32 %v3306_v23, 16  ;;  %v226_v5 = vld [vmem:[%s3280_s6 + $0x3c] sm:$0xf]  ;;  %s2614_s8 = sshll.u32 %s4265_s13, 6 }
  0x22   : > { %v265_v1 = vrot.slane %v263_v58, 5  ;;  %v283_v3 = vrot.slane %v281_v27, 4  ;;  %v287_v4 = vshll.u32 %v3342_v53, 16  ;;  %v340_v21 = vshrl.u32 %v224_v59, 16  ;;  %v3365_v25 = vld [vmem:[%s3280_s6 + $0x40] sm:$0xf]  ;;  %s205_s11 = sadd.s32 %s2614_s8, %s2613_s7 }
  0x23   : > { %v256_v9 = vsel %vm3346_vm4, %v251_v60, %v255_v61  ;;  %v260_v16 = vor.u32 %v259_v57, %v255_v61  ;;  %v275_v6 = vrot.slane %v274_v63, 4  ;;  %v279_v19 = vrot.slane %v277_v2, 5  ;;  %v3377_v37 = vld [vmem:[%s3280_s6 + $0x20] sm:$0x1]  ;;  %v3390_v57 = vld [vmem:[%s3280_s6 + $0x2c] sm:$0x1] }
  0x24   : > { %v289_v20 = vrot.slane %v287_v4, 5  ;;  %v343_v24 = vshll.u32 %v224_v59, 16  ;;  %v353_v27 = vshrl.u32 %v3356_v0, 16  ;;  %v2675_v28 = vcombine.low %v224_v59, %v3356_v0  ;;  %v228_v63 = vld [vmem:[%s3280_s6 + $0x48] sm:$0xf]  ;;  %s2615_s22 = sshll.u32 %s4263_s14, 7 }
  0x25   : > { %v261_v26 = vrot.slane %v260_v16, 4  ;;  %v364_v29 = vshrl.u32 %v226_v5, 16  ;;  %v280_v30 = vsel %vm3346_vm4, %v275_v6, %v279_v19  ;;  %v284_v34 = vor.u32 %v283_v3, %v279_v19  ;;  %v3405_v3 = vld [vmem:[%s3280_s6 + $0x4c] sm:$0xf]  ;;  %v441_v56 = vld [vmem:[%s3280_s6 + $0x48] sm:$0xe]  ;;  %s207_s23 = sadd.s32 %s2615_s22, %s205_s11 }
  0x26   : > { %2910 = vmatmul.mubr.msk.bf16.gmra.mxu0 %vm909_vm1, %v2674_v50  ;;  %v3372_v35 = vrot.slane %v340_v21, 4  ;;  %v3374_v36 = vrot.slane %v343_v24, 5  ;;  %v367_v42 = vshll.u32 %v226_v5, 16  ;;  %v377_v45 = vshrl.u32 %v3365_v25, 16  ;;  %s2616_s12 = sshll.u32 %s207_s23, 3 }
  0x27   : > { %v266_v38 = vsel %vm3346_vm4, %v261_v26, %v265_v1  ;;  %2913 = vmatprep.mubr.msk.bf16.mxu0 %vm909_vm1, %v2675_v28  ;;  %v3382_v40 = vrot.slane %v364_v29, 4  ;;  %v285_v50 = vrot.slane %v284_v34, 4  ;;  %v2676_v51 = vcombine.low %v226_v5, %v3365_v25  ;;  %v3419_v28 = vld [vmem:[%s3280_s6 + $0x58] sm:$0xf]  ;;  %s4015_s24 = scalar_lea.vmem %s4203_s3, %s2616_s12 }
  0x28   : > { %v3385_v46 = vcombine.low %v256_v9, %v266_v38  ;;  %v298_v52 = vor.u32 %v297_v49, %v3332_v44  ;;  %v3392_v58 = vrot.slane %v367_v42, 5  ;;  %v301_v59 = vshll.u32 %v3317_v33, 16 }
  0x29   : > { %v307_v60 = vrot.slane %v305_v41, 4  ;;  %v311_v61 = vshll.u32 %v3377_v37, 16  ;;  %v290_v1 = vsel %vm3346_vm4, %v285_v50, %v289_v20  ;;  %v322_v49 = vor.u32 %v321_v55, %v318_v54  ;;  %v230_v20 = vld [vmem:[%s3280_s6 + $0x54] sm:$0xf] }
  0x2a   : > { %2923 = vmatprep.mubr.msk.bf16.mxu1 %vm909_vm1, %v3385_v46  ;;  %v299_v44 = vrot.slane %v298_v52, 4  ;;  %v325_v2 = vshll.u32 %v3329_v43, 16  ;;  %v3407_v4 = vcombine.low %v280_v30, %v290_v1  ;;  %v303_v41 = vrot.slane %v301_v59, 5 }
  0x2b   : > { %v313_v5 = vrot.slane %v311_v61, 5  ;;  %v331_v9 = vrot.slane %v329_v47, 4  ;;  %v323_v16 = vrot.slane %v322_v49, 4  ;;  %v335_v19 = vshll.u32 %v3390_v57, 16  ;;  %v3431_v61 = vld [vmem:[%s3280_s6 + $0x38] sm:$0x1] }
  0x2c   : > { %v327_v6 = vrot.slane %v325_v2, 5  ;;  %v388_v21 = vshrl.u32 %v228_v63, 16  ;;  %2924 = vmatmul.mubr.msk.bf16.vlgmr.msra.gmra.mxu1 %vm909_vm1, %v3407_v4  ;;  %v304_v54 = vsel %vm3346_vm4, %v299_v44, %v303_v41  ;;  %v308_v55 = vor.u32 %v307_v60, %v303_v41  ;;  %v3442_v49 = vld [vmem:[%s3280_s6 + $0x44] sm:$0x1] }
  0x2d   : > { %v391_v24 = vshll.u32 %v228_v63, 16  ;;  %v401_v26 = vshrl.u32 %v3405_v3, 16  ;;  %2958 = vmatpush3.bf16.msra.mxu1 %v3276_v10  ;;  %v337_v30 = vrot.slane %v335_v19, 5  ;;  %v2677_v50 = vcombine.low %v228_v63, %v3405_v3 }
  0x2e   : > { %2914 = vmatmul.mubr.msk.bf16.gmra.mxu0 %vm909_vm1, %v2676_v51  ;;  %v328_v47 = vsel %vm3346_vm4, %v323_v16, %v327_v6  ;;  %v332_v29 = vor.u32 %v331_v9, %v327_v6  ;;  %v390_v34 = vrot.slane %v388_v21, 4  ;;  %v309_v38 = vrot.slane %v308_v55, 4  ;;  %3052 = vmatprep.subr.msk.bf16.mxu1 %vm934_vm0, %v3267_v7  ;;  %v2628_v16 = vld [vmem:[%s3280_s6 + $0xc] sm:$0xf]  ;;  %v3463_v55 = vld [vmem:[%s3280_s6 + $0x10] sm:$0xf] }
  0x2f   : > { %v393_v42 = vrot.slane %v391_v24, 5  ;;  %v412_v52 = vshrl.u32 %v230_v20, 16  ;;  %v415_v10 = vshll.u32 %v230_v20, 16  ;;  %v425_v51 = vshrl.u32 %v3419_v28, 16  ;;  %2917 = vmatprep.mubr.msk.bf16.mxu0 %vm909_vm1, %v2677_v50  ;;  %v3471_v50 = vld [vmem:[%s3280_s6 + $0x50] sm:$0x1] }
  0x30   : > { %v333_v59 = vrot.slane %v332_v29, 4  ;;  %v2678_v60 = vcombine.low %v230_v20, %v3419_v28  ;;  %v314_v1 = vsel %vm3346_vm4, %v309_v38, %v313_v5  ;;  %v346_v63 = vor.u32 %v3374_v36, %v3372_v35 }
  0x31   : > { %v3436_v44 = vrot.slane %v412_v52, 4  ;;  %v349_v7 = vshll.u32 %v3356_v0, 16  ;;  %v3444_v2 = vcombine.low %v304_v54, %v314_v1  ;;  %v417_v9 = vrot.slane %v415_v10, 5 }
  0x32   : > { %v338_v41 = vsel %vm3346_vm4, %v333_v59, %v337_v30  ;;  %v355_v5 = vrot.slane %v353_v27, 4  ;;  %v347_v19 = vrot.slane %v346_v63, 4  ;;  %v359_v35 = vshll.u32 %v3431_v61, 16  ;;  %v2630_v63 = vld [vmem:[%s3280_s6 + $0x18] sm:$0xf] }
  0x33   : > { %v3451_v6 = vcombine.low %v328_v47, %v338_v41  ;;  %v351_v21 = vrot.slane %v349_v7, 5  ;;  %2927 = vmatprep.mubr.msk.bf16.mxu1 %vm909_vm1, %v3444_v2  ;;  %v370_v36 = vor.u32 %v3392_v58, %v3382_v40  ;;  %v373_v20 = vshll.u32 %v3365_v25, 16 }
  0x34   : > { %v379_v54 = vrot.slane %v377_v45, 4  ;;  %v383_v27 = vshll.u32 %v3442_v49, 16  ;;  %v361_v29 = vrot.slane %v359_v35, 5  ;;  %v555_v30 = vshrl.u32 %v2628_v16, 16 }
  0x35   : > { %2928 = vmatmul.mubr.msk.bf16.gmra.mxu1 %vm909_vm1, %v3451_v6  ;;  %v352_v24 = vsel %vm3346_vm4, %v347_v19, %v351_v21  ;;  %v356_v47 = vor.u32 %v355_v5, %v351_v21  ;;  %v371_v40 = vrot.slane %v370_v36, 4  ;;  %v375_v58 = vrot.slane %v373_v20, 5  ;;  %v3483_v19 = vld [vmem:[%s3280_s6 + $0x1c] sm:$0xf] }
  0x36   : > { %2918 = vmatmul.mubr.msk.bf16.gmra.mxu0 %vm909_vm1, %v2678_v60  ;;  %v385_v45 = vrot.slane %v383_v27, 5  ;;  %v558_v38 = vshll.u32 %v2628_v16, 16  ;;  %v3473_v59 = vrot.slane %v555_v30, 4  ;;  %v568_v10 = vshrl.u32 %v3463_v55, 16  ;;  %4218 = vst [vmem:[#allocation4_spill] sm:$0xff] %v3483_v19 }
  0x37   : > { %v357_v52 = vrot.slane %v356_v47, 4  ;;  %v2709_v1 = vcombine.low %v2628_v16, %v3463_v55  ;;  %v376_v7 = vsel %vm3346_vm4, %v371_v40, %v375_v58  ;;  %v380_v41 = vor.u32 %v379_v54, %v375_v58  ;;  %v3494_v40 = vld [vmem:[%s3280_s6 + $0x5c] sm:$0x1] }
  0x38   : > { %v3480_v5 = vrot.slane %v558_v38, 5  ;;  %v394_v60 = vor.u32 %v393_v42, %v390_v34  ;;  %v397_v35 = vshll.u32 %v3405_v3, 16  ;;  %v403_v36 = vrot.slane %v401_v26, 4 }
  0x39   : > { %v362_v21 = vsel %vm3346_vm4, %v357_v52, %v361_v29  ;;  %2941 = vmatprep.mubr.msk.bf16.mxu0 %vm909_vm1, %v2709_v1  ;;  %v407_v16 = vshll.u32 %v3471_v50, 16  ;;  %v381_v54 = vrot.slane %v380_v41, 4  ;;  %v579_v47 = vshrl.u32 %v2630_v63, 16  ;;  %v2632_v52 = vld [vmem:[%s3280_s6 + $0x24] sm:$0xf] }
  0x3a   : > { %v3490_v20 = vcombine.low %v352_v24, %v362_v21  ;;  %v395_v27 = vrot.slane %v394_v60, 4  ;;  %v399_v34 = vrot.slane %v397_v35, 5  ;;  %v582_v30 = vshll.u32 %v2630_v63, 16  ;;  %v3504_v1 = vld [vmem:[%s3280_s6 + $0x28] sm:$0xf] }
  0x3b   : > { %v409_v42 = vrot.slane %v407_v16, 5  ;;  %v592_v29 = vshrl.u32 %v3483_v19, 16  ;;  %v386_v26 = vsel %vm3346_vm4, %v381_v54, %v385_v45  ;;  %v581_v58 = vrot.slane %v579_v47, 4  ;;  %v2634_v16 = vld [vmem:[%s3280_s6 + $0x30] sm:$0xf] }
  0x3c   : > { %2931 = vmatprep.mubr.msk.bf16.mxu1 %vm909_vm1, %v3490_v20  ;;  %v2710_v24 = vcombine.low %v2630_v63, %v3483_v19  ;;  %v418_v38 = vor.u32 %v417_v9, %v3436_v44  ;;  %v3506_v41 = vcombine.low %v376_v7, %v386_v26  ;;  %v400_v60 = vsel %vm3346_vm4, %v395_v27, %v399_v34  ;;  %v3522_v26 = vld [vmem:[%s3280_s6 + $0x34] sm:$0xf] }
  0x3d   : > { %v404_v21 = vor.u32 %v403_v36, %v399_v34  ;;  %v584_v35 = vrot.slane %v582_v30, 5  ;;  %v421_v54 = vshll.u32 %v3419_v28, 16  ;;  %v427_v44 = vrot.slane %v425_v51, 4  ;;  %4219 = vst [vmem:[#allocation5_spill] sm:$0xff] %v3522_v26 }
  0x3e   : > { %2942 = vmatmul.mubr.msk.bf16.vlgmr.msra.gmra.mxu0 %vm909_vm1, %v2710_v24  ;;  %v419_v45 = vrot.slane %v418_v38, 4  ;;  %v431_v9 = vshll.u32 %v3494_v40, 16  ;;  %2932 = vmatmul.mubr.msk.bf16.gmra.mxu1 %vm909_vm1, %v3506_v41  ;;  %v603_v7 = vshrl.u32 %v2632_v52, 16  ;;  %v606_v36 = vshll.u32 %v2632_v52, 16 }
  0x3f   : > { %v405_v63 = vrot.slane %v404_v21, 4  ;;  %2976 = vmatpush3.bf16.msra.mxu0 %v3284_v12  ;;  %v423_v47 = vrot.slane %v421_v54, 5  ;;  %v2711_v30 = vcombine.low %v2632_v52, %v3504_v1  ;;  %v627_v51 = vshrl.u32 %v2634_v16, 16  ;;  %v3533_v12 = vld [vmem:[%s3280_s6 + $0x14] sm:$0x1] }
  0x40   : > { %v433_v34 = vrot.slane %v431_v9, 5  ;;  %3053 = vmatprep.subr.msk.bf16.mxu0 %vm934_vm0, %v3269_v8  ;;  %v3528_v38 = vrot.slane %v603_v7, 4  ;;  %v3530_v21 = vrot.slane %v606_v36, 5  ;;  %v630_v32 = vshll.u32 %v2634_v16, 16  ;;  %v3549_v36 = vld [vmem:[%s3280_s6 + $0x20] sm:$0x1] }
  0x41   : > { %v410_v24 = vsel %vm3346_vm4, %v405_v63, %v409_v42  ;;  %v424_v52 = vsel %vm3346_vm4, %v419_v45, %v423_v47  ;;  %v428_v9 = vor.u32 %v427_v44, %v423_v47  ;;  %2945 = vmatprep.mubr.msk.bf16.mxu0 %vm909_vm1, %v2711_v30  ;;  %v3540_v8 = vrot.slane %v627_v51, 4  ;;  %v2636_v47 = vld [vmem:[%s3280_s6 + $0x3c] sm:$0xf] }
  0x42   : > { %v3535_v54 = vcombine.low %v400_v60, %v410_v24  ;;  %v3542_v18 = vrot.slane %v630_v32, 5  ;;  %v640_v42 = vshrl.u32 %v3522_v26, 16  ;;  %v2712_v63 = vcombine.low %v2634_v16, %v3522_v26 }
  0x43   : > { %v561_v7 = vor.u32 %v3480_v5, %v3473_v59  ;;  %v429_v60 = vrot.slane %v428_v9, 4  ;;  %v564_v45 = vshll.u32 %v3463_v55, 16  ;;  %v570_v32 = vrot.slane %v568_v10, 4  ;;  %v3564_v10 = vld [vmem:[%s3280_s6 + $0x40] sm:$0xf] }
  0x44   : > { %2935 = vmatprep.mubr.msk.bf16.mxu1 %vm909_vm1, %v3535_v54  ;;  %v574_v44 = vshll.u32 %v3533_v12, 16  ;;  %v585_v30 = vor.u32 %v584_v35, %v581_v58  ;;  %v588_v59 = vshll.u32 %v3483_v19, 16  ;;  %v594_v5 = vrot.slane %v592_v29, 4  ;;  %v2638_v35 = vld [vmem:[%s3280_s6 + $0x48] sm:$0xf] }
  0x45   : > { %v562_v16 = vrot.slane %v561_v7, 4  ;;  %v434_v51 = vsel %vm3346_vm4, %v429_v60, %v433_v34  ;;  %v566_v24 = vrot.slane %v564_v45, 5  ;;  %v598_v22 = vshll.u32 %v3549_v36, 16 }
  0x46   : > { %2946 = vmatmul.mubr.msk.bf16.gmra.mxu0 %vm909_vm1, %v2712_v63  ;;  %v576_v9 = vrot.slane %v574_v44, 5  ;;  %v3566_v62 = vcombine.low %v424_v52, %v434_v51  ;;  %v586_v27 = vrot.slane %v585_v30, 4  ;;  %v590_v7 = vrot.slane %v588_v59, 5  ;;  %v3572_v63 = vld [vmem:[%s3280_s6 + $0x4c] sm:$0xf] }
  0x47   : > { %v651_v58 = vshrl.u32 %v2636_v47, 16  ;;  %v567_v29 = vsel %vm3346_vm4, %v562_v16, %v566_v24  ;;  %v571_v15 = vor.u32 %v570_v32, %v566_v24  ;;  %v600_v19 = vrot.slane %v598_v22, 5 }
  0x48   : > { %4220 = vst [vmem:[#allocation6_spill] sm:$0xff] %v3566_v62  ;;  %v654_v34 = vshll.u32 %v2636_v47, 16  ;;  %2936 = vmatmul.mubr.msk.bf16.gmra.mxu1 %vm909_vm1, %v3566_v62  ;;  %v591_v52 = vsel %vm3346_vm4, %v586_v27, %v590_v7  ;;  %v595_v60 = vor.u32 %v594_v5, %v590_v7  ;;  %v2713_v22 = vcombine.low %v2636_v47, %v3564_v10  ;;  %v3587_v27 = vld [vmem:[%s3280_s6 + $0x2c] sm:$0x1] }
  0x49   : > { %v3578_v45 = vrot.slane %v651_v58, 4  ;;  %v572_v30 = vrot.slane %v571_v15, 4  ;;  %v675_v32 = vshrl.u32 %v2638_v35, 16  ;;  %v678_v51 = vshll.u32 %v2638_v35, 16  ;;  %v3598_v58 = vld [vmem:[%s3280_s6 + $0x38] sm:$0x1] }
  0x4a   : > { %v3581_v16 = vrot.slane %v654_v34, 5  ;;  %v596_v59 = vrot.slane %v595_v60, 4  ;;  %v2714_v62 = vcombine.low %v2638_v35, %v3572_v63  ;;  %2949 = vmatprep.mubr.msk.bf16.mxu0 %vm909_vm1, %v2713_v22  ;;  %v609_v47 = vor.u32 %v3530_v21, %v3528_v38  ;;  %4221 = vst [vmem:[#allocation7_spill] sm:$0xff] %v3598_v58  ;;  %v2640_v22 = vld [vmem:[%s3280_s6 + $0x54] sm:$0xf] }
  0x4b   : > { %v577_v5 = vsel %vm3346_vm4, %v572_v30, %v576_v9  ;;  %v3592_v15 = vrot.slane %v675_v32, 4  ;;  %v612_v7 = vshll.u32 %v3504_v1, 16  ;;  %v3604_v60 = vrot.slane %v678_v51, 5 }
  0x4c   : > { %v3600_v34 = vcombine.low %v567_v29, %v577_v5  ;;  %v601_v35 = vsel %vm3346_vm4, %v596_v59, %v600_v19  ;;  %v4223_v9 = vshrl.u32 %v3504_v1, 16  ;;  %v610_v38 = vrot.slane %v609_v47, 4 }
  0x4d   : > { %v3609_v32 = vcombine.low %v591_v52, %v601_v35  ;;  %v614_v21 = vrot.slane %v612_v7, 5  ;;  %v622_v24 = vshll.u32 %v3587_v27, 16  ;;  %v633_v19 = vor.u32 %v3542_v18, %v3540_v8  ;;  %v3620_v52 = vld [vmem:[%s3280_s6 + $0x58] sm:$0xf]  ;;  %v2642_v35 = vld [vmem:[%s3280_s6 + $0x60] sm:$0xf] }
  0x4e   : > { %4222 = vst [vmem:[#allocation8_spill] sm:$0xff] %v3600_v34  ;;  %v618_v30 = vrot.slane %v4223_v9, 4  ;;  %2950 = vmatmul.mubr.msk.bf16.gmra.mxu0 %vm909_vm1, %v2714_v62  ;;  %2959 = vmatprep.mubr.msk.bf16.mxu1 %vm909_vm1, %v3600_v34  ;;  %v636_v29 = vshll.u32 %v3522_v26, 16  ;;  %v642_v59 = vrot.slane %v640_v42, 4  ;;  %v646_v51 = vshll.u32 %v3598_v58, 16  ;;  %4225 = vst [vmem:[#allocation10_spill] sm:$0xff] %v3620_v52 }
  0x4f   : > { %4224 = vst [vmem:[#allocation9_spill] sm:$0xff] %v3609_v32  ;;  %v615_v62 = vsel %vm3346_vm4, %v610_v38, %v614_v21  ;;  %v624_v47 = vrot.slane %v622_v24, 5  ;;  %v699_v7 = vshrl.u32 %v2640_v22, 16  ;;  %v634_v9 = vrot.slane %v633_v19, 4  ;;  %v3628_v42 = vld [vmem:[%s3280_s6 + $0x64] sm:$0xf] }
  0x50   : > { %v619_v5 = vor.u32 %v618_v30, %v614_v21  ;;  %2960 = vmatmul.mubr.msk.bf16.vlgmr.msra.gmra.mxu1 %vm909_vm1, %v3609_v32  ;;  %v638_v18 = vrot.slane %v636_v29, 5  ;;  %v648_v8 = vrot.slane %v646_v51, 5  ;;  %v702_v44 = vshll.u32 %v2640_v22, 16  ;;  %v3636_v19 = vld [vmem:[%s3280_s6 + $0x44] sm:$0x1] }
  0x51   : > { %2994 = vmatpush3.bf16.msra.mxu1 %v3288_v13  ;;  %v701_v58 = vrot.slane %v699_v7, 4  ;;  %v712_v38 = vshrl.u32 %v3620_v52, 16  ;;  %v2715_v24 = vcombine.low %v2640_v22, %v3620_v52  ;;  %v723_v32 = vshrl.u32 %v2642_v35, 16 }
  0x52   : > { %v620_v34 = vrot.slane %v619_v5, 4  ;;  %v639_v30 = vsel %vm3346_vm4, %v634_v9, %v638_v18  ;;  %v643_v21 = vor.u32 %v642_v59, %v638_v18  ;;  %v704_v26 = vrot.slane %v702_v44, 5  ;;  %3054 = vmatprep.subr.msk.bf16.mxu1 %vm934_vm0, %v3278_v11 }
  0x53   : > { %2953 = vmatprep.mubr.msk.bf16.mxu0 %vm909_vm1, %v2715_v24  ;;  %v726_v22 = vshll.u32 %v2642_v35, 16  ;;  %v736_v29 = vshrl.u32 %v3628_v42, 16  ;;  %v2716_v59 = vcombine.low %v2642_v35, %v3628_v42  ;;  %v725_v5 = vrot.slane %v723_v32, 4  ;;  %v3655_v24 = vld [vmem:[%s3280_s6 + $0x50] sm:$0x1] }
  0x54   : > { %v625_v13 = vsel %vm3346_vm4, %v620_v34, %v624_v47  ;;  %v644_v51 = vrot.slane %v643_v21, 4  ;;  %v657_v7 = vor.u32 %v3581_v16, %v3578_v45  ;;  %v660_v11 = vshll.u32 %v3564_v10, 16 }
  0x55   : > { %v3645_v44 = vcombine.low %v615_v62, %v625_v13  ;;  %v728_v9 = vrot.slane %v726_v22, 5  ;;  %v4227_v34 = vshrl.u32 %v3564_v10, 16  ;;  %v670_v18 = vshll.u32 %v3636_v19, 16 }
  0x56   : > { %2954 = vmatmul.mubr.msk.bf16.gmra.mxu0 %vm909_vm1, %v2716_v59  ;;  %v649_v32 = vsel %vm3346_vm4, %v644_v51, %v648_v8  ;;  %v658_v45 = vrot.slane %v657_v7, 4  ;;  %v681_v16 = vor.u32 %v3604_v60, %v3592_v15  ;;  %v684_v62 = vshll.u32 %v3572_v63, 16  ;;  %v3672_v51 = vld [vmem:[%s3280_s6 + $0x5c] sm:$0x1] }
  0x57   : > { %4226 = vst [vmem:[#allocation11_spill] sm:$0xff] %v3645_v44  ;;  %v666_v47 = vrot.slane %v4227_v34, 4  ;;  %2963 = vmatprep.mubr.msk.bf16.mxu1 %vm909_vm1, %v3645_v44  ;;  %2977 = vmatprep.mubr.msk.bf16.mxu0 %vm909_vm1, %v3385_v46  ;;  %v3666_v35 = vcombine.low %v639_v30, %v649_v32  ;;  %v662_v21 = vrot.slane %v660_v11, 5  ;;  %v672_v13 = vrot.slane %v670_v18, 5  ;;  %v3680_v11 = vld [vmem:[%s3280_s6 + $0x68] sm:$0x1] }
  0x58   : > { %v4229_v22 = vshrl.u32 %v3572_v63, 16  ;;  %v682_v34 = vrot.slane %v681_v16, 4  ;;  %v686_v44 = vrot.slane %v684_v62, 5  ;;  %v694_v8 = vshll.u32 %v3655_v24, 16 }
  0x59   : > { %4228 = vst [vmem:[#allocation12_spill] sm:$0xff] %v3666_v35  ;;  %v705_v15 = vor.u32 %v704_v26, %v701_v58  ;;  %2964 = vmatmul.mubr.msk.bf16.gmra.mxu1 %vm909_vm1, %v3666_v35  ;;  %v663_v46 = vsel %vm3346_vm4, %v658_v45, %v662_v21  ;;  %v667_v60 = vor.u32 %v666_v47, %v662_v21  ;;  %v708_v30 = vshll.u32 %v3620_v52, 16  ;;  %v435_v52 = vld [vmem:[%s3280_s6] sm:$0xe] }
  0x5a   : > { %v690_v59 = vrot.slane %v4229_v22, 4  ;;  %v714_v7 = vrot.slane %v712_v38, 4  ;;  %v687_v18 = vsel %vm3346_vm4, %v682_v34, %v686_v44  ;;  %v696_v16 = vrot.slane %v694_v8, 5 }
  0x5b   : > { %v706_v62 = vrot.slane %v705_v15, 4  ;;  %v668_v26 = vrot.slane %v667_v60, 4  ;;  %v710_v58 = vrot.slane %v708_v30, 5  ;;  %v718_v22 = vshll.u32 %v3672_v51, 16 }
  0x5c   : > { %v691_v32 = vor.u32 %v690_v59, %v686_v44  ;;  %v729_v35 = vor.u32 %v728_v9, %v725_v5  ;;  %v732_v47 = vshll.u32 %v3628_v42, 16  ;;  %v738_v21 = vrot.slane %v736_v29, 4  ;;  %v436_v29 = vld [vmem:[%s3280_s6 + $0xc] sm:$0xe] }
  0x5d   : > { %v742_v38 = vshll.u32 %v3680_v11, 16  ;;  %v673_v34 = vsel %vm3346_vm4, %v668_v26, %v672_v13  ;;  %v711_v44 = vsel %vm3346_vm4, %v706_v62, %v710_v58  ;;  %v715_v59 = vor.u32 %v714_v7, %v710_v58 }
  0x5e   : > { %v692_v45 = vrot.slane %v691_v32, 4  ;;  %v720_v8 = vrot.slane %v718_v22, 5  ;;  %2978 = vmatmul.mubr.msk.bf16.vlgmr.msra.gmra.mxu0 %vm909_vm1, %v3407_v4  ;;  %v3701_v9 = vcombine.low %v663_v46, %v673_v34  ;;  %v730_v15 = vrot.slane %v729_v35, 4  ;;  %v437_v4 = vld [vmem:[%s3280_s6 + $0x18] sm:$0xe] }
  0x5f   : > { %v734_v60 = vrot.slane %v732_v47, 5  ;;  %2981 = vmatprep.mubr.msk.bf16.mxu0 %vm909_vm1, %v3444_v2  ;;  %3012 = vmatpush3.bf16.msra.mxu0 %v3292_v14  ;;  %v716_v7 = vrot.slane %v715_v59, 4  ;;  %v744_v32 = vrot.slane %v742_v38, 5  ;;  %v2619_v62 = vrot.slane %v435_v52, 9 }
  0x60   : > { %v697_v13 = vsel %vm3346_vm4, %v692_v45, %v696_v16  ;;  %2967 = vmatprep.mubr.msk.bf16.mxu1 %vm909_vm1, %v3701_v9  ;;  %v4232_v16 = vrot.slane %v3336_v48, 5  ;;  %v2620_v2 = vrot.slane %v436_v29, 9  ;;  %v4233_v26 = vrot.slane %v3300_v17, 5  ;;  %v439_v45 = vld [vmem:[%s3280_s6 + $0x30] sm:$0xe] }
  0x61   : > { %v3709_v30 = vcombine.low %v687_v18, %v697_v13  ;;  %v735_v46 = vsel %vm3346_vm4, %v730_v15, %v734_v60  ;;  %v739_v35 = vor.u32 %v738_v21, %v734_v60  ;;  %v438_v18 = vld [vmem:[%s3280_s6 + $0x24] sm:$0xe]  ;;  %v721_v52 = vsel %vm3346_vm4, %v716_v7, %v720_v8  ;;  %v440_v29 = vld [vmem:[%s3280_s6 + $0x3c] sm:$0xe] }
  0x62   : > { %v476_v14 = vsel %vm3696_vm7, %v3313_v31, %v4232_v16  ;;  %v473_v58 = vsel %vm3696_vm7, %v2619_v62, %v4233_v26  ;;  %v4234_v48 = vrot.slane %v3342_v53, 5  ;;  %v2621_v22 = vrot.slane %v437_v4, 9 }
  0x63   : > { %2968 = vmatmul.mubr.msk.bf16.gmra.mxu1 %vm909_vm1, %v3709_v30  ;;  %v3737_v47 = vcombine.low %v711_v44, %v721_v52  ;;  %v740_v21 = vrot.slane %v739_v35, 4  ;;  %v2758_v38 = vcombine.low %v473_v58, %v476_v14  ;;  %v4235_v34 = vrot.slane %v3306_v23, 5  ;;  %v442_v35 = vld [vmem:[%s3280_s6 + $0x54] sm:$0xe] }
  0x64   : > { %v3734_v31 = vsel %vm3696_vm7, %v3324_v39, %v4234_v48  ;;  %v486_v59 = vrot.slane %v3317_v33, 5  ;;  %v489_v39 = vrot.slane %v3377_v37, 5  ;;  %v2622_v8 = vrot.slane %v438_v18, 9 }
  0x65   : > { %v3743_v17 = vsel %vm3696_vm7, %v2620_v2, %v4235_v34  ;;  %2971 = vmatprep.mubr.msk.bf16.mxu1 %vm909_vm1, %v3737_v47  ;;  %v745_v23 = vsel %vm3346_vm4, %v740_v21, %v744_v32  ;;  %v493_v44 = vrot.slane %v3329_v43, 5  ;;  %v496_v13 = vrot.slane %v3390_v57, 5  ;;  %v2652_v2 = vld [vmem:[%s3280_s6 + $0xc] sm:$0xe] }
  0x66   : > { %v2759_v53 = vcombine.low %v3743_v17, %v3734_v31  ;;  %v2623_v15 = vrot.slane %v439_v45, 9  ;;  %v3756_v60 = vcombine.low %v735_v46, %v745_v23  ;;  %2982 = vmatmul.mubr.msk.bf16.gmra.mxu0 %vm909_vm1, %v3451_v6  ;;  %v3762_v33 = vsel %vm3696_vm7, %v2621_v22, %v486_v59  ;;  %v2653_v45 = vld [vmem:[%s3280_s6 + $0x18] sm:$0xe]  ;;  %v4238_v31 = vld [vmem:[#allocation5_spill] sm:$0xff] }
  0x67   : > { %v488_v37 = vrot.slane %v486_v59, 4  ;;  %v500_v4 = vrot.slane %v3356_v0, 5  ;;  %2985 = vmatprep.mubr.msk.bf16.mxu0 %vm909_vm1, %v3490_v20  ;;  %v3770_v43 = vsel %vm3696_vm7, %v2622_v8, %v493_v44  ;;  %v495_v57 = vrot.slane %v493_v44, 4 }
  0x68   : > { %v503_v7 = vrot.slane %v3431_v61, 5  ;;  %v2624_v6 = vrot.slane %v440_v29, 9  ;;  %v507_v46 = vrot.slane %v3365_v25, 5  ;;  %v510_v61 = vrot.slane %v3442_v49, 5  ;;  %v2654_v29 = vld [vmem:[%s3280_s6 + $0x24] sm:$0xe] }
  0x69   : > { %v490_v32 = vsel %vm3696_vm7, %v488_v37, %v489_v39  ;;  %v3777_v62 = vsel %vm3696_vm7, %v2623_v15, %v500_v4  ;;  %v502_v0 = vrot.slane %v500_v4, 4  ;;  %v3784_v16 = vsel %vm3696_vm7, %v495_v57, %v496_v13  ;;  %v4236_v15 = vld [vmem:[#allocation4_spill] sm:$0xff]  ;;  %v2655_v37 = vld [vmem:[%s3280_s6 + $0x30] sm:$0xe]  ;;  %v2656_v57 = vld [vmem:[%s3280_s6 + $0x3c] sm:$0xe] }
  0x6a   : > { %v2760_v20 = vcombine.low %v3762_v33, %v490_v32  ;;  %v2625_v14 = vrot.slane %v441_v56, 9  ;;  %v2761_v18 = vcombine.low %v3770_v43, %v3784_v16  ;;  %v3798_v52 = vsel %vm3696_vm7, %v2624_v6, %v507_v46 }
  0x6b   : > { %2972 = vmatmul.mubr.msk.bf16.gmra.mxu1 %vm909_vm1, %v3756_v60  ;;  %v3794_v25 = vsel %vm3696_vm7, %v502_v0, %v503_v7  ;;  %v509_v26 = vrot.slane %v507_v46, 4  ;;  %v514_v58 = vrot.slane %v3405_v3, 5  ;;  %v517_v48 = vrot.slane %v3471_v50, 5 }
  0x6c   : > { %2995 = vmatprep.mubr.msk.bf16.mxu1 %vm909_vm1, %v2758_v38  ;;  %v2762_v49 = vcombine.low %v3777_v62, %v3794_v25  ;;  %v2626_v22 = vrot.slane %v442_v35, 9  ;;  %v521_v34 = vrot.slane %v3419_v28, 5  ;;  %v524_v59 = vrot.slane %v3494_v40, 5  ;;  %v4244_v25 = vld [vmem:[#allocation11_spill] sm:$0xff] }
  0x6d   : > { %v3808_v21 = vsel %vm3696_vm7, %v509_v26, %v510_v61  ;;  %v2660_v39 = vrot.slane %v2652_v2, 9  ;;  %v3816_v3 = vsel %vm3696_vm7, %v2625_v14, %v514_v58  ;;  %v516_v50 = vrot.slane %v514_v58, 4  ;;  %v2657_v14 = vld [vmem:[%s3280_s6 + $0x48] sm:$0xe]  ;;  %v4237_v2 = vld [vmem:[#allocation3_spill] sm:$0xff] }
  0x6e   : > { %v2763_v38 = vcombine.low %v3798_v52, %v3808_v21  ;;  %v780_v8 = vrot.slane %v3463_v55, 5  ;;  %2986 = vmatmul.mubr.msk.bf16.gmra.mxu0 %vm909_vm1, %v3506_v41  ;;  %v3824_v28 = vsel %vm3696_vm7, %v2626_v22, %v521_v34  ;;  %v523_v40 = vrot.slane %v521_v34, 4  ;;  %v2658_v34 = vld [vmem:[%s3280_s6 + $0x54] sm:$0xe] }
  0x6f   : > { %v783_v23 = vrot.slane %v3533_v12, 5  ;;  %v2661_v44 = vrot.slane %v2653_v45, 9  ;;  %2989 = vmatprep.mubr.msk.bf16.mxu0 %vm909_vm1, %v3535_v54  ;;  %v3831_v13 = vsel %vm3696_vm7, %v516_v50, %v517_v48  ;;  %v787_v33 = vrot.slane %v4236_v15, 5 }
  0x70   : > { %v3835_v55 = vsel %vm3696_vm7, %v2660_v39, %v780_v8  ;;  %v782_v41 = vrot.slane %v780_v8, 4  ;;  %v2764_v12 = vcombine.low %v3816_v3, %v3831_v13  ;;  %v3843_v4 = vsel %vm3696_vm7, %v523_v40, %v524_v59  ;;  %v4240_v8 = vld [vmem:[#allocation6_spill] sm:$0xff] }
  0x71   : > { %v790_v54 = vrot.slane %v3549_v36, 5  ;;  %v2662_v56 = vrot.slane %v2654_v29, 9  ;;  %v2765_v7 = vcombine.low %v3824_v28, %v3843_v4  ;;  %v3855_v32 = vsel %vm3696_vm7, %v2661_v44, %v787_v33  ;;  %v2659_v44 = vld [vmem:[%s3280_s6 + $0x60] sm:$0xe] }
  0x72   : > { %v3851_v6 = vsel %vm3696_vm7, %v782_v41, %v783_v23  ;;  %v789_v0 = vrot.slane %v787_v33, 4  ;;  %v794_v46 = vrot.slane %v3504_v1, 5  ;;  %v797_v35 = vrot.slane %v3587_v27, 5 }
  0x73   : > { %2996 = vmatmul.mubr.msk.bf16.vlgmr.msra.gmra.mxu1 %vm909_vm1, %v2759_v53  ;;  %v2788_v36 = vcombine.low %v3835_v55, %v3851_v6  ;;  %v2663_v61 = vrot.slane %v2655_v37, 9  ;;  %v801_v17 = vrot.slane %v4238_v31, 5  ;;  %v4239_v53 = vld [vmem:[#allocation7_spill] sm:$0xff]  ;;  %v2664_v48 = vrot.slane %v2656_v57, 9  ;;  %v4241_v55 = vld [vmem:[#allocation8_spill] sm:$0xff]  ;;  %v4242_v6 = vld [vmem:[#allocation10_spill] sm:$0xff] }
  0x74   : > { %3030 = vmatpush3.bf16.msra.mxu1 %v4237_v2  ;;  %2999 = vmatprep.mubr.msk.bf16.mxu1 %vm909_vm1, %v2760_v20  ;;  %v791_v26 = vsel %vm3696_vm7, %v789_v0, %v790_v54  ;;  %v804_v58 = vrot.slane %v4239_v53, 5  ;;  %v795_v1 = vsel %vm3696_vm7, %v2662_v56, %v794_v46  ;;  %v796_v27 = vrot.slane %v794_v46, 4 }
  0x75   : > { %v2789_v22 = vcombine.low %v3855_v32, %v791_v26  ;;  %v808_v45 = vrot.slane %v3564_v10, 5  ;;  %v802_v20 = vsel %vm3696_vm7, %v2663_v61, %v801_v17  ;;  %v803_v59 = vrot.slane %v801_v17, 4  ;;  %v4245_v26 = vld [vmem:[#allocation12_spill] sm:$0xff] }
  0x76   : > { %v811_v39 = vrot.slane %v3636_v19, 5  ;;  %v2665_v50 = vrot.slane %v2657_v14, 9  ;;  %2990 = vmatmul.mubr.msk.bf16.gmra.mxu0 %vm909_vm1, %v4240_v8  ;;  %v798_v29 = vsel %vm3696_vm7, %v796_v27, %v797_v35  ;;  %v815_v10 = vrot.slane %v3572_v63, 5 }
  0x77   : > { %v809_v40 = vsel %vm3696_vm7, %v2664_v48, %v808_v45  ;;  %v810_v23 = vrot.slane %v808_v45, 4  ;;  %3013 = vmatprep.mubr.msk.bf16.mxu0 %vm909_vm1, %v4241_v55  ;;  %v2790_v41 = vcombine.low %v795_v1, %v798_v29  ;;  %v805_v19 = vsel %vm3696_vm7, %v803_v59, %v804_v58 }
  0x78   : > { %v818_v15 = vrot.slane %v3655_v24, 5  ;;  %v2666_v33 = vrot.slane %v2658_v34, 9  ;;  %v2791_v37 = vcombine.low %v802_v20, %v805_v19  ;;  %v816_v56 = vsel %vm3696_vm7, %v2665_v50, %v815_v10 }
  0x79   : > { %v812_v54 = vsel %vm3696_vm7, %v810_v23, %v811_v39  ;;  %v817_v57 = vrot.slane %v815_v10, 4  ;;  %v822_v32 = vrot.slane %v4242_v6, 5  ;;  %v825_v0 = vrot.slane %v3672_v51, 5  ;;  %v3998_v10 = vld [vmem:[%s4202_s2] ss:$0 sm:$0xff] }
  0x7a   : > { %v2792_v63 = vcombine.low %v809_v40, %v812_v54  ;;  %v2667_v46 = vrot.slane %v2659_v44, 9  ;;  %v829_v35 = vrot.slane %v3628_v42, 5  ;;  %v832_v61 = vrot.slane %v3680_v11, 5  ;;  %v4243_v42 = vld [vmem:[#allocation9_spill] sm:$0xff] }
  0x7b   : > { %3000 = vmatmul.mubr.msk.bf16.gmra.mxu1 %vm909_vm1, %v2761_v18  ;;  %v819_v24 = vsel %vm3696_vm7, %v817_v57, %v818_v15  ;;  %v823_v51 = vsel %vm3696_vm7, %v2666_v33, %v822_v32  ;;  %v824_v2 = vrot.slane %v822_v32, 4 }
  0x7c   : > { %3003 = vmatprep.mubr.msk.bf16.mxu1 %vm909_vm1, %v2762_v49  ;;  %v2793_v14 = vcombine.low %v816_v56, %v819_v24  ;;  %v830_v43 = vsel %vm3696_vm7, %v2667_v46, %v829_v35  ;;  %v831_v16 = vrot.slane %v829_v35, 4 }
  0x7d   : > { %v826_v18 = vsel %vm3696_vm7, %v824_v2, %v825_v0 }
  0x7e   : > { %3014 = vmatmul.mubr.msk.bf16.vlgmr.msra.gmra.mxu0 %vm909_vm1, %v4243_v42  ;;  %v2794_v11 = vcombine.low %v823_v51, %v826_v18  ;;  %v833_v62 = vsel %vm3696_vm7, %v831_v16, %v832_v61 }
  0x7f   : > { %3017 = vmatprep.mubr.msk.bf16.mxu0 %vm909_vm1, %v4244_v25  ;;  %v2795_v49 = vcombine.low %v830_v43, %v833_v62 }
  0x83   : > { %3004 = vmatmul.mubr.msk.bf16.gmra.mxu1 %vm909_vm1, %v2763_v38 }
  0x84   : > { %3007 = vmatprep.mubr.msk.bf16.mxu1 %vm909_vm1, %v2764_v12 }
  0x86   : > { %3018 = vmatmul.mubr.msk.bf16.gmra.mxu0 %vm909_vm1, %v4245_v26 }
  0x87   : > { %3021 = vmatprep.mubr.msk.bf16.mxu0 %vm909_vm1, %v3701_v9 }
  0x8b   : > { %3008 = vmatmul.mubr.msk.bf16.gmra.mxu1 %vm909_vm1, %v2765_v7 }
  0x8c   : > { %3031 = vmatprep.mubr.msk.bf16.mxu1 %vm909_vm1, %v2788_v36 }
  0x8e   : > { %3022 = vmatmul.mubr.msk.bf16.gmra.mxu0 %vm909_vm1, %v3709_v30 }
  0x8f   : > { %3025 = vmatprep.mubr.msk.bf16.mxu0 %vm909_vm1, %v3737_v47 }
  0x93   : > { %3032 = vmatmul.mubr.msk.bf16.vlgmr.msra.gmra.mxu1 %vm909_vm1, %v2789_v22 }
  0x94   : > { %3035 = vmatprep.mubr.msk.bf16.mxu1 %vm909_vm1, %v2790_v41 }
  0x96   : > { %3026 = vmatmul.mubr.msk.bf16.gmra.mxu0 %vm909_vm1, %v3756_v60 }
  0x9b   : > { %3036 = vmatmul.mubr.msk.bf16.gmra.mxu1 %vm909_vm1, %v2791_v37 }
  0x9c   : > { %3039 = vmatprep.mubr.msk.bf16.mxu1 %vm909_vm1, %v2792_v63 }
  0xa3   : > { %3040 = vmatmul.mubr.msk.bf16.gmra.mxu1 %vm909_vm1, %v2793_v14 }
  0xa4   : > { %3043 = vmatprep.mubr.msk.bf16.mxu1 %vm909_vm1, %v2794_v11 }
  0xab   : > { %3044 = vmatmul.mubr.msk.bf16.gmra.mxu1 %vm909_vm1, %v2795_v49 }
  0xde   : > { %v2907_v5 = vpop.f32.mrf.mxu0 }
  0xdf   : > { %v1037_v41 = vadd.f32 %v2907_v5, %v3998_v10 }
  0xe0   : > { %v972_v9 = vpop.f32.mrf.mxu0 }
  0xe1   : > { %v1035_v54 = vadd.f32 %v3998_v10, %v972_v9 }
  0xe2   : > { %v2908_v30 = vpop.f32.mrf.mxu0 }
  0xe3   : > { %v1038_v6 = vadd.f32 %v2908_v30, %v3998_v10 }
  0xe4   : > { %v975_v47 = vpop.f32.mrf.mxu0 }
  0xe5   : > { %v1036_v35 = vadd.f32 %v3998_v10, %v975_v47 }
  0xe6   : > { %v2911_v52 = vpop.f32.mrf.mxu0 }
  0xe7   : > { %v1041_v43 = vadd.f32 %v2911_v52, %v3998_v10 }
  0xe8   : > { %v3953_v21 = vpop.f32.mrf.mxu0 }
  0xe9   : > { %v1039_v9 = vadd.f32 %v3998_v10, %v3953_v21 }
  0xea   : > { %v3955_v38 = vpop.f32.mrf.mxu0 }
  0xec   : > { %v3957_v60 = vpop.f32.mrf.mxu0  ;;  %v2925_v3 = vpop.f32.mrf.mxu1 }
  0xed   : > { %v1237_v56 = vadd.f32 %v2925_v3, %v1037_v41 }
  0xee   : > { %v3959_v28 = vpop.f32.mrf.mxu0  ;;  %v1172_v13 = vpop.f32.mrf.mxu1 }
  0xef   : > { %v1235_v32 = vadd.f32 %v1172_v13, %v1035_v54  ;;  %v1042_v13 = vadd.f32 %v3955_v38, %v3998_v10 }
  0xf0   : > { %v3961_v12 = vpop.f32.mrf.mxu0  ;;  %v2926_v4 = vpop.f32.mrf.mxu1 }
  0xf1   : > { %v1238_v61 = vadd.f32 %v2926_v4, %v1038_v6 }
  0xf2   : > { %v3963_v7 = vpop.f32.mrf.mxu0  ;;  %v1175_v36 = vpop.f32.mrf.mxu1 }
  0xf3   : > { %v1236_v18 = vadd.f32 %v1175_v36, %v1036_v35 }
  0xf4   : > { %v3965_v31 = vpop.f32.mrf.mxu0 }
  0xf5   : > { %v3967_v17 = vpop.f32.mrf.mxu1 }
  0xf6   : > { %v3969_v53 = vpop.f32.mrf.mxu0  ;;  %v1241_v30 = vadd.f32 %v3967_v17, %v1041_v43  ;;  %v1045_v17 = vadd.f32 %v3959_v28, %v3998_v10 }
  0xf7   : > { %v3971_v58 = vpop.f32.mrf.mxu1 }
  0xf8   : > { %v3973_v48 = vpop.f32.mrf.mxu0  ;;  %v1239_v4 = vadd.f32 %v3971_v58, %v1039_v9 }
  0xf9   : > { %v3975_v22 = vpop.f32.mrf.mxu1 }
  0xfa   : > { %v3977_v1 = vpop.f32.mrf.mxu0 }
  0xfb   : > { %v3979_v27 = vpop.f32.mrf.mxu1 }
  0xfc   : > { %v3981_v45 = vpop.f32.mrf.mxu0 }
  0xfe   : > { %v2943_v34 = vpop.f32.mrf.mxu0  ;;  %v3985_v20 = vpop.f32.mrf.mxu1 }
  0xff   : > { %v1445_v0 = vadd.f32 %v2943_v34, %v1237_v56  ;;  %v1040_v34 = vadd.f32 %v3998_v10, %v3957_v60  ;;  %v1245_v28 = vadd.f32 %v3985_v20, %v1045_v17 }
 0x100   : > { %v1380_v59 = vpop.f32.mrf.mxu0  ;;  %v3988_v39 = vpop.f32.mrf.mxu1 }
 0x101   : > { %v1443_v14 = vadd.f32 %v1380_v59, %v1235_v32  ;;  %v1240_v58 = vadd.f32 %v3979_v27, %v1040_v34  ;;  %v1043_v32 = vadd.f32 %v3998_v10, %v3961_v12  ;;  %v1046_v27 = vadd.f32 %v3963_v7, %v3998_v10 }
 0x102   : > { %v2944_v50 = vpop.f32.mrf.mxu0  ;;  %v3991_v8 = vpop.f32.mrf.mxu1  ;;  %v1044_v12 = vadd.f32 %v3998_v10, %v3965_v31 }
 0x103   : > { %v1446_v42 = vadd.f32 %v2944_v50, %v1238_v61  ;;  %v1242_v50 = vadd.f32 %v3975_v22, %v1042_v13 }
 0x104   : > { %v1383_v29 = vpop.f32.mrf.mxu0  ;;  %v3993_v40 = vpop.f32.mrf.mxu1 }
 0x105   : > { %v1444_v49 = vadd.f32 %v1383_v29, %v1236_v18 }
 0x106   : > { %v2947_v23 = vpop.f32.mrf.mxu0 }
 0x107   : > { %v1449_v36 = vadd.f32 %v2947_v23, %v1241_v30 }
 0x108   : > { %v1396_v44 = vpop.f32.mrf.mxu0  ;;  %v4001_v55 = vpop.f32.mrf.mxu1 }
 0x109   : > { %v1447_v29 = vadd.f32 %v1396_v44, %v1239_v4 }
 0x10a   : > { %v2948_v19 = vpop.f32.mrf.mxu0  ;;  %v4004_v15 = vpop.f32.mrf.mxu1 }
 0x10b   : > { %v1450_v23 = vadd.f32 %v2948_v19, %v1242_v50  ;;  %v1243_v19 = vadd.f32 %v3988_v39, %v1043_v32 }
 0x10c   : > { %v1399_v33 = vpop.f32.mrf.mxu0  ;;  %v4006_v37 = vpop.f32.mrf.mxu1 }
 0x10e   : > { %v2951_v57 = vpop.f32.mrf.mxu0  ;;  %v4009_v63 = vpop.f32.mrf.mxu1 }
 0x10f   : > { %v1453_v35 = vadd.f32 %v2951_v57, %v1245_v28  ;;  %v1244_v57 = vadd.f32 %v3993_v40, %v1044_v12  ;;  %v1050_v40 = vadd.f32 %v3977_v1, %v3998_v10 }
 0x110   : > { %v1412_v46 = vpop.f32.mrf.mxu0  ;;  %v2961_v24 = vpop.f32.mrf.mxu1 }
 0x111   : > { %v1645_v51 = vadd.f32 %v2961_v24, %v1445_v0  ;;  %v1448_v0 = vadd.f32 %v1399_v33, %v1240_v58  ;;  %v1451_v43 = vadd.f32 %v1412_v46, %v1243_v19 }
 0x112   : > { %v2952_v2 = vpop.f32.mrf.mxu0  ;;  %v1580_v16 = vpop.f32.mrf.mxu1 }
 0x113   : > { %1693 = vst [vmem:[%s4015_s24 + $0x10] sm:$0xff] %v1645_v51  ;;  %v1643_v11 = vadd.f32 %v1580_v16, %v1443_v14  ;;  %v1049_v14 = vadd.f32 %v3969_v53, %v3998_v10  ;;  %v1246_v51 = vadd.f32 %v3991_v8, %v1046_v27  ;;  %v1047_v53 = vadd.f32 %v3998_v10, %v3973_v48 }
 0x114   : > { %v1415_v62 = vpop.f32.mrf.mxu0  ;;  %v2962_v25 = vpop.f32.mrf.mxu1 }
 0x115   : > { %1691 = vst [vmem:[%s4015_s24] sm:$0xff] %v1643_v11  ;;  %v1646_v26 = vadd.f32 %v2962_v25, %v1446_v42  ;;  %v1454_v18 = vadd.f32 %v2952_v2, %v1246_v51  ;;  %v1249_v8 = vadd.f32 %v4001_v55, %v1049_v14  ;;  %v1452_v46 = vadd.f32 %v1415_v62, %v1244_v57 }
 0x116   : > { %v4021_v5 = vpop.f32.mrf.mxu0  ;;  %v1583_v47 = vpop.f32.mrf.mxu1  ;;  %v1247_v2 = vadd.f32 %v4004_v15, %v1047_v53  ;;  %v1048_v62 = vadd.f32 %v3998_v10, %v3981_v45 }
 0x117   : > { %1694 = vst [vmem:[%s4015_s24 + $0x18] sm:$0xff] %v1646_v26  ;;  %v1644_v52 = vadd.f32 %v1583_v47, %v1444_v49  ;;  %v1457_v9 = vadd.f32 %v4021_v5, %v1249_v8  ;;  %v1250_v47 = vadd.f32 %v4006_v37, %v1050_v40 }
 0x118   : > { %v4027_v3 = vpop.f32.mrf.mxu0  ;;  %v1248_v5 = vadd.f32 %v4009_v63, %v1048_v62 }
 0x119   : > { %1692 = vst [vmem:[%s4015_s24 + $0x8] sm:$0xff] %v1644_v52  ;;  %v2965_v59 = vpop.f32.mrf.mxu1  ;;  %v1455_v52 = vadd.f32 %v4027_v3, %v1247_v2 }
 0x11a   : > { %v4035_v21 = vpop.f32.mrf.mxu0  ;;  %v1649_v41 = vadd.f32 %v2965_v59, %v1449_v36 }
 0x11b   : > { %v1596_v54 = vpop.f32.mrf.mxu1  ;;  %v1458_v4 = vadd.f32 %v4035_v21, %v1250_v47 }
 0x11c   : > { %v1431_v38 = vpop.f32.mrf.mxu0  ;;  %1697 = vst [vmem:[%s4015_s24 + $0x30] sm:$0xff] %v1649_v41  ;;  %v1647_v60 = vadd.f32 %v1596_v54, %v1447_v29 }
 0x11d   : > { %v2966_v56 = vpop.f32.mrf.mxu1  ;;  %v1456_v45 = vadd.f32 %v1431_v38, %v1248_v5 }
 0x11e   : > { %v4042_v6 = vpop.f32.mrf.mxu0  ;;  %1695 = vst [vmem:[%s4015_s24 + $0x20] sm:$0xff] %v1647_v60  ;;  %v1650_v22 = vadd.f32 %v2966_v56, %v1450_v23 }
 0x11f   : > { %v1599_v44 = vpop.f32.mrf.mxu1  ;;  %v1845_v57 = vadd.f32 %v4042_v6, %v3998_v10 }
 0x120   : > { %v4048_v24 = vpop.f32.mrf.mxu0  ;;  %1698 = vst [vmem:[%s4015_s24 + $0x38] sm:$0xff] %v1650_v22  ;;  %v1648_v61 = vadd.f32 %v1599_v44, %v1448_v0 }
 0x121   : > { %v1843_v53 = vadd.f32 %v3998_v10, %v4048_v24 }
 0x122   : > { %v4056_v33 = vpop.f32.mrf.mxu0  ;;  %1696 = vst [vmem:[%s4015_s24 + $0x28] sm:$0xff] %v1648_v61 }
 0x123   : > { %v2969_v20 = vpop.f32.mrf.mxu1 }
 0x124   : > { %v1653_v7 = vadd.f32 %v2969_v20, %v1453_v35  ;;  %v4062_v16 = vpop.f32.mrf.mxu0 }
 0x125   : > { %v1612_v39 = vpop.f32.mrf.mxu1  ;;  %v1844_v6 = vadd.f32 %v3998_v10, %v4062_v16 }
 0x126   : > { %1701 = vst [vmem:[%s4015_s24 + $0x50] sm:$0xff] %v1653_v7  ;;  %v1651_v31 = vadd.f32 %v1612_v39, %v1451_v43  ;;  %v4066_v11 = vpop.f32.mrf.mxu0 }
 0x127   : > { %v2970_v42 = vpop.f32.mrf.mxu1 }
 0x128   : > { %1699 = vst [vmem:[%s4015_s24 + $0x40] sm:$0xff] %v1651_v31  ;;  %v1654_v25 = vadd.f32 %v2970_v42, %v1454_v18  ;;  %v4072_v26 = vpop.f32.mrf.mxu0 }
 0x129   : > { %v1615_v49 = vpop.f32.mrf.mxu1 }
 0x12a   : > { %1702 = vst [vmem:[%s4015_s24 + $0x58] sm:$0xff] %v1654_v25  ;;  %v1652_v30 = vadd.f32 %v1615_v49, %v1452_v46  ;;  %v4079_v55 = vpop.f32.mrf.mxu0  ;;  %v1846_v49 = vadd.f32 %v4056_v33, %v3998_v10 }
 0x12b   : > { %v2973_v48 = vpop.f32.mrf.mxu1 }
 0x12c   : > { %1700 = vst [vmem:[%s4015_s24 + $0x48] sm:$0xff] %v1652_v30  ;;  %v1657_v1 = vadd.f32 %v2973_v48, %v1457_v9  ;;  %v4086_v15 = vpop.f32.mrf.mxu0  ;;  %v1849_v30 = vadd.f32 %v4066_v11, %v3998_v10 }
 0x12d   : > { %v1628_v13 = vpop.f32.mrf.mxu1 }
 0x12e   : > { %1705 = vst [vmem:[%s4015_s24 + $0x70] sm:$0xff] %v1657_v1  ;;  %v1655_v36 = vadd.f32 %v1628_v13, %v1455_v52  ;;  %v4091_v59 = vpop.f32.mrf.mxu0 }
 0x12f   : > { %v2974_v34 = vpop.f32.mrf.mxu1 }
 0x130   : > { %1703 = vst [vmem:[%s4015_s24 + $0x60] sm:$0xff] %v1655_v36  ;;  %v1658_v37 = vadd.f32 %v2974_v34, %v1458_v4  ;;  %v4094_v17 = vpop.f32.mrf.mxu0  ;;  %v1847_v4 = vadd.f32 %v3998_v10, %v4072_v26  ;;  %v1853_v26 = vadd.f32 %v4091_v59, %v3998_v10 }
 0x131   : > { %v1631_v3 = vpop.f32.mrf.mxu1 }
 0x132   : > { %1706 = vst [vmem:[%s4015_s24 + $0x78] sm:$0xff] %v1658_v37  ;;  %v1656_v50 = vadd.f32 %v1631_v3, %v1456_v45  ;;  %v4097_v41 = vpop.f32.mrf.mxu0  ;;  %v1850_v37 = vadd.f32 %v4079_v55, %v3998_v10 }
 0x133   : > { %v2997_v29 = vpop.f32.mrf.mxu1 }
 0x134   : > { %1704 = vst [vmem:[%s4015_s24 + $0x68] sm:$0xff] %v1656_v50  ;;  %v4100_v54 = vpop.f32.mrf.mxu0  ;;  %v2045_v8 = vadd.f32 %v2997_v29, %v1845_v57 }
 0x135   : > { %v1980_v63 = vpop.f32.mrf.mxu1 }
 0x136   : > { %v4102_v58 = vpop.f32.mrf.mxu0  ;;  %v2043_v40 = vadd.f32 %v1980_v63, %v1843_v53  ;;  %v1848_v63 = vadd.f32 %v3998_v10, %v4086_v15  ;;  %v1851_v15 = vadd.f32 %v3998_v10, %v4094_v17 }
 0x137   : > { %v2998_v21 = vpop.f32.mrf.mxu1 }
 0x138   : > { %v4104_v60 = vpop.f32.mrf.mxu0  ;;  %v2046_v48 = vadd.f32 %v2998_v21, %v1846_v49 }
 0x139   : > { %v1983_v23 = vpop.f32.mrf.mxu1 }
 0x13a   : > { %v4106_v56 = vpop.f32.mrf.mxu0  ;;  %v2044_v1 = vadd.f32 %v1983_v23, %v1844_v6 }
 0x13b   : > { %v3001_v38 = vpop.f32.mrf.mxu1 }
 0x13c   : > { %v4108_v28 = vpop.f32.mrf.mxu0  ;;  %v2049_v16 = vadd.f32 %v3001_v38, %v1849_v30 }
 0x13d   : > { %v1996_v32 = vpop.f32.mrf.mxu1 }
 0x13e   : > { %v3015_v22 = vpop.f32.mrf.mxu0  ;;  %v2047_v3 = vadd.f32 %v1996_v32, %v1847_v4 }
 0x13f   : > { %v3002_v0 = vpop.f32.mrf.mxu1  ;;  %v2197_v2 = vadd.f32 %v3015_v22, %v2045_v8  ;;  %v1854_v8 = vadd.f32 %v4097_v41, %v3998_v10 }
 0x140   : > { %v2132_v27 = vpop.f32.mrf.mxu0  ;;  %v2050_v23 = vadd.f32 %v3002_v0, %v1850_v37 }
 0x141   : > { %v1999_v44 = vpop.f32.mrf.mxu1  ;;  %v2195_v24 = vadd.f32 %v2132_v27, %v2043_v40  ;;  %v1852_v40 = vadd.f32 %v3998_v10, %v4100_v54  ;;  %v1855_v54 = vadd.f32 %v3998_v10, %v4104_v60  ;;  %v1856_v60 = vadd.f32 %v3998_v10, %v4108_v28 }
 0x142   : > { %v3016_v35 = vpop.f32.mrf.mxu0  ;;  %v2048_v55 = vadd.f32 %v1999_v44, %v1848_v63 }
 0x143   : > { %v3005_v19 = vpop.f32.mrf.mxu1  ;;  %v2198_v13 = vadd.f32 %v3016_v35, %v2046_v48 }
 0x144   : > { %v2135_v12 = vpop.f32.mrf.mxu0  ;;  %v2053_v57 = vadd.f32 %v3005_v19, %v1853_v26  ;;  %v1857_v19 = vadd.f32 %v4102_v58, %v3998_v10 }
 0x145   : > { %v4110_v61 = vpop.f32.mrf.mxu1  ;;  %v2196_v36 = vadd.f32 %v2135_v12, %v2044_v1 }
 0x146   : > { %v3019_v14 = vpop.f32.mrf.mxu0  ;;  %v2051_v44 = vadd.f32 %v4110_v61, %v1851_v15 }
 0x147   : > { %v4112_v20 = vpop.f32.mrf.mxu1  ;;  %v2201_v50 = vadd.f32 %v3019_v14, %v2049_v16 }
 0x148   : > { %v2148_v43 = vpop.f32.mrf.mxu0 }
 0x149   : > { %v4114_v51 = vpop.f32.mrf.mxu1  ;;  %v2199_v38 = vadd.f32 %v2148_v43, %v2047_v3 }
 0x14a   : > { %v3020_v39 = vpop.f32.mrf.mxu0  ;;  %v2052_v61 = vadd.f32 %v4114_v51, %v1852_v40 }
 0x14b   : > { %v4116_v7 = vpop.f32.mrf.mxu1  ;;  %v2202_v32 = vadd.f32 %v3020_v39, %v2050_v23 }
 0x14c   : > { %v2151_v31 = vpop.f32.mrf.mxu0  ;;  %v2057_v58 = vadd.f32 %v4116_v7, %v1857_v19 }
 0x14d   : > { %v4120_v18 = vpop.f32.mrf.mxu1  ;;  %v2200_v53 = vadd.f32 %v2151_v31, %v2048_v55  ;;  %v2054_v31 = vadd.f32 %v4112_v20, %v1854_v8 }
 0x14e   : > { %v3023_v25 = vpop.f32.mrf.mxu0  ;;  %v2055_v51 = vadd.f32 %v4120_v18, %v1855_v54 }
 0x14f   : > { %v4122_v42 = vpop.f32.mrf.mxu1  ;;  %v2205_v39 = vadd.f32 %v3023_v25, %v2053_v57 }
 0x150   : > { %v2164_v52 = vpop.f32.mrf.mxu0 }
 0x151   : > { %v4126_v46 = vpop.f32.mrf.mxu1 }
 0x152   : > { %v3024_v45 = vpop.f32.mrf.mxu0 }
 0x153   : > { %v3033_v9 = vpop.f32.mrf.mxu1  ;;  %v2206_v25 = vadd.f32 %v3024_v45, %v2054_v31 }
 0x154   : > { %v2397_v62 = vadd.f32 %v3033_v9, %v2197_v2  ;;  %v2167_v35 = vpop.f32.mrf.mxu0  ;;  %v2203_v2 = vadd.f32 %v2164_v52, %v2051_v44  ;;  %v1858_v52 = vadd.f32 %v4106_v56, %v3998_v10  ;;  %v2056_v56 = vadd.f32 %v4126_v46, %v1856_v60 }
 0x155   : > { %v2332_v47 = vpop.f32.mrf.mxu1 }
 0x156   : > { %2806 = vst [vmem:[%s4015_s24 + $0x90] sm:$0xff] %v2397_v62  ;;  %v2395_v33 = vadd.f32 %v2332_v47, %v2195_v24  ;;  %v3027_v43 = vpop.f32.mrf.mxu0  ;;  %v2204_v24 = vadd.f32 %v2167_v35, %v2052_v61  ;;  %v2058_v7 = vadd.f32 %v4122_v42, %v1858_v52 }
 0x157   : > { %v3034_v5 = vpop.f32.mrf.mxu1  ;;  %v2209_v1 = vadd.f32 %v3027_v43, %v2057_v58 }
 0x158   : > { %2804 = vst [vmem:[%s4015_s24 + $0x80] sm:$0xff] %v2395_v33  ;;  %v2398_v34 = vadd.f32 %v3034_v5, %v2198_v13  ;;  %v2180_v41 = vpop.f32.mrf.mxu0 }
 0x159   : > { %v2335_v11 = vpop.f32.mrf.mxu1  ;;  %v2207_v5 = vadd.f32 %v2180_v41, %v2055_v51 }
 0x15a   : > { %2807 = vst [vmem:[%s4015_s24 + $0x98] sm:$0xff] %v2398_v34  ;;  %v2396_v29 = vadd.f32 %v2335_v11, %v2196_v36  ;;  %v3028_v62 = vpop.f32.mrf.mxu0 }
 0x15b   : > { %v3037_v21 = vpop.f32.mrf.mxu1  ;;  %v2210_v18 = vadd.f32 %v3028_v62, %v2058_v7 }
 0x15c   : > { %2805 = vst [vmem:[%s4015_s24 + $0x88] sm:$0xff] %v2396_v29  ;;  %v2401_v22 = vadd.f32 %v3037_v21, %v2201_v50  ;;  %v2183_v16 = vpop.f32.mrf.mxu0 }
 0x15d   : > { %v2348_v27 = vpop.f32.mrf.mxu1  ;;  %v2208_v45 = vadd.f32 %v2183_v16, %v2056_v56 }
 0x15e   : > { %2810 = vst [vmem:[%s4015_s24 + $0xb0] sm:$0xff] %v2401_v22  ;;  %v2399_v12 = vadd.f32 %v2348_v27, %v2199_v38 }
 0x15f   : > { %v3038_v14 = vpop.f32.mrf.mxu1 }
 0x160   : > { %2808 = vst [vmem:[%s4015_s24 + $0xa0] sm:$0xff] %v2399_v12  ;;  %v2402_v59 = vadd.f32 %v3038_v14, %v2202_v32 }
 0x161   : > { %v2351_v0 = vpop.f32.mrf.mxu1 }
 0x162   : > { %2811 = vst [vmem:[%s4015_s24 + $0xb8] sm:$0xff] %v2402_v59  ;;  %v2400_v49 = vadd.f32 %v2351_v0, %v2200_v53 }
 0x163   : > { %v3041_v17 = vpop.f32.mrf.mxu1 }
 0x164   : > { %2809 = vst [vmem:[%s4015_s24 + $0xa8] sm:$0xff] %v2400_v49  ;;  %v2405_v6 = vadd.f32 %v3041_v17, %v2205_v39 }
 0x165   : > { %v2364_v9 = vpop.f32.mrf.mxu1 }
 0x166   : > { %2814 = vst [vmem:[%s4015_s24 + $0xd0] sm:$0xff] %v2405_v6  ;;  %v2403_v30 = vadd.f32 %v2364_v9, %v2203_v2 }
 0x167   : > { %v3042_v48 = vpop.f32.mrf.mxu1 }
 0x168   : > { %2812 = vst [vmem:[%s4015_s24 + $0xc0] sm:$0xff] %v2403_v30  ;;  %v2406_v20 = vadd.f32 %v3042_v48, %v2206_v25 }
 0x169   : > { %v2367_v47 = vpop.f32.mrf.mxu1 }
 0x16a   : > { %2815 = vst [vmem:[%s4015_s24 + $0xd8] sm:$0xff] %v2406_v20  ;;  %v2404_v13 = vadd.f32 %v2367_v47, %v2204_v24 }
 0x16b   : > { %v3045_v33 = vpop.f32.mrf.mxu1 }
 0x16c   : > { %2813 = vst [vmem:[%s4015_s24 + $0xc8] sm:$0xff] %v2404_v13  ;;  %v2409_v4 = vadd.f32 %v3045_v33, %v2209_v1 }
 0x16d   : > { %v2380_v36 = vpop.f32.mrf.mxu1 }
 0x16e   : > { %2818 = vst [vmem:[%s4015_s24 + $0xf0] sm:$0xff] %v2409_v4  ;;  %v2407_v34 = vadd.f32 %v2380_v36, %v2207_v5 }
 0x16f   : > { %v3046_v11 = vpop.f32.mrf.mxu1 }
 0x170   : > { %2816 = vst [vmem:[%s4015_s24 + $0xe0] sm:$0xff] %v2407_v34  ;;  %v2410_v37 = vadd.f32 %v3046_v11, %v2210_v18 }
 0x171   : > { %v2383_v3 = vpop.f32.mrf.mxu1 }
 0x172   : > { %2819 = vst [vmem:[%s4015_s24 + $0xf8] sm:$0xff] %v2410_v37  ;;  %v2408_v10 = vadd.f32 %v2383_v3, %v2208_v45 }
 0x174   : > { %2817 = vst [vmem:[%s4015_s24 + $0xe8] sm:$0xff] %v2408_v10 }
 0x175 PF: > { %s13_s18 = sadd.s32 1, %s3182_s18   ;;  %s4246_s12 = smov %s3170_s15 }
 0x176   : > { %p10_p9 = scmp.ge.s32.totalorder %s13_s18, 10   ;;  %s4247_s13 = smov %s3174_s16 }
 0x177   : > { %s4248_s14 = smov %s3178_s17  ;;  %s4249_s15 = smov %s4253_s19 }
 0x178   : > { %s4250_s16 = smov %s4257_s20  ;;  %s4251_s17 = smov %s4261_s21 }
 0x179   :  { %12 = sbr.rel (!%p10_p9) target bundleno = 4 (0x4), region = 73 }

</bundles_post_ra>
